<compile_context>
chip_gen: v5e
topology: v5e:2x2
jax: 0.10.0
libtpu: 0.0.40
codegen_flags: <defaults>
</compile_context>

<pallas_src>
import jax
import jax.numpy as jnp
from jax import lax
from jax.experimental import pallas as pl
from jax.experimental.pallas import tpu as pltpu

LANE = 128  # TPU lane width; padded width of the policy+value output slab.


def worker_kernel(z_ref, goals_ref, mask_ref, hc0_ref,
                  wzh_ref, bias_ref, phi_rep_ref, sel_ref, cw1_ref, cvec_ref,
                  uc_ref, av_ref,
                  hc_scr, zh_scr):
    t = pl.program_id(0)
    B, D = z_ref.shape
    H = hc_scr.shape[2]
    A = H // D
    L = av_ref.shape[1]          # padded output lane width (== LANE)

    # One-time init: load hc0 into the carried state and zero the fused-gate
    # staging buffer (its padding lanes D..LANE-1 must stay exactly 0).
    @pl.when(t == 0)
    def _():
        hc_scr[...] = hc0_ref[...]
        zh_scr[...] = jnp.zeros_like(zh_scr)

    # hidden = (mask * h, mask * c)  -- episode-reset mask per step.
    mask = mask_ref[...]                                    # (B, 1)
    h0 = mask * hc_scr[0, :, :]                             # (B, H)
    c0 = mask * hc_scr[1, :, :]                             # (B, H)

    # Fused LSTM gate matmul: zh = [z | 0-pad | h0], one K = LANE + H pass.
    # wzh rows [0, D) = W_ih^T, rows [LANE, LANE+H) = W_hh^T, rest zero.
    zh_scr[:, 0:D] = z_ref[...]
    zh_scr[:, LANE:LANE + H] = h0
    gates = (jnp.dot(zh_scr[...], wzh_ref[...],
                     preferred_element_type=jnp.float32)
             + bias_ref[...])                               # (B, 4H)
    i_g = jax.nn.sigmoid(gates[:, 0:H])
    f_g = jax.nn.sigmoid(gates[:, H:2 * H])
    g_g = jnp.tanh(gates[:, 2 * H:3 * H])
    o_g = jax.nn.sigmoid(gates[:, 3 * H:4 * H])
    cx = f_g * c0 + i_g * g_g                               # (B, H)
    u = o_g * jnp.tanh(cx)                                  # (B, H)

    # Carry the new state and write the per-step lane-dense (2, B, H) output.
    hc_scr[0, :, :] = u
    hc_scr[1, :, :] = cx
    uc_ref[0, :, :] = u
    uc_ref[1, :, :] = cx

    # goals_s = stack(goals).sum(0);  w_rep[b, d*A+a] = (goals_s @ phi)[b, d]
    # (phi folded with the lane-replication matrix offline into phi_rep).
    goals_sum = jnp.sum(goals_ref[...], axis=0)             # (B, D)
    w_rep = jnp.dot(goals_sum, phi_rep_ref[...],
                    preferred_element_type=jnp.float32)     # (B, H)

    # logits[b, a] = sum_d w[b, d] * u[b, d*A + a]   (== einsum 'bk,bka->ba')
    # sel[l, c] = 1 iff c == l mod A is precomputed offline (resident input).
    p = w_rep * u                                           # (B, H)
    logits_wide = jnp.dot(p, sel_ref[...],
                          preferred_element_type=jnp.float32)   # (B, L)

    # Numerically stable softmax over the first A lanes only; EUP approx
    # reciprocal + one Newton step so rows sum to 1 to ~1e-6.
    lane = lax.broadcasted_iota(jnp.int32, (1, L), 1)       # (1, L)
    logits_m = jnp.where(lane < A, logits_wide, -1e30)
    m = jnp.max(logits_m, axis=-1, keepdims=True)
    e = jnp.where(lane < A, jnp.exp(logits_m - m), 0.0)
    s = jnp.sum(e, axis=-1, keepdims=True)
    r = pl.reciprocal(s, approx=True)
    r = r * (2.0 - s * r)                                   # Newton refine
    a_wide = e * r

    # Critic: Linear(H, 50) zero-padded to L lanes -> ReLU -> VPU dot with the
    # second-layer weight row; the layer-2 bias rides on a constant-1 hidden
    # unit in lane L-1 (avoids an N=1, K=50 MXU pass).
    cb1p = cvec_ref[0:1, :]                                 # (1, L)
    cw2r = cvec_ref[1:2, :]                                 # (1, L)
    h1 = jnp.maximum(
        jnp.dot(u, cw1_ref[...], preferred_element_type=jnp.float32) + cb1p,
        0.0)                                                # (B, L)
    val = jnp.sum(h1 * cw2r, axis=-1, keepdims=True)        # (B, 1)

    # Single lane-dense (B, L) store: lanes [0, A) = policy, lane A = value.
    av_ref[...] = a_wide + jnp.where(lane == A, val, 0.0)


def pack_worker_params(wih, whh, bias, phi, cw1, cb1, cw2, cb2, num_actions):
    """Pack / fold raw (pre-transposed) Worker weights into kernel params."""
    f32 = jnp.float32
    D = phi.shape[0]
    H, HID = cw1.shape
    A = num_actions
    G = wih.shape[1]                                               # 4H
    assert HID < LANE - 1, "critic hidden width must leave room for bias unit"
    # Fused-gate weight: rows [0, D) = W_ih^T, rows [LANE, LANE+H) = W_hh^T.
    wzh = jnp.zeros((LANE + H, G), f32)
    wzh = wzh.at[0:D, :].set(wih.astype(f32))
    wzh = wzh.at[LANE:LANE + H, :].set(whh.astype(f32))
    # Fold phi with the replication matrix rep (rep[d, d*A + a] = 1).
    rep = jnp.repeat(jnp.eye(D, dtype=f32), A, axis=1)             # (D, D*A)
    phi_rep = (phi.astype(f32) @ rep)                              # (D, H)
    # Precomputed 0/1 selection matrix: sel[l, c] = 1 iff c == (l mod A).
    row = jnp.arange(H)[:, None]
    col = jnp.arange(LANE)[None, :]
    sel = ((row % A) == col).astype(f32)                           # (H, LANE)
    # Critic layer 1 zero-padded to LANE lanes; lane LANE-1 is a constant-1
    # hidden unit that carries the layer-2 bias.
    cw1p = jnp.zeros((H, LANE), f32).at[:, :HID].set(cw1)
    cb1p = jnp.zeros((1, LANE), f32).at[:, :HID].set(cb1).at[0, LANE - 1].set(1.0)
    cw2r = (jnp.zeros((1, LANE), f32).at[:, :HID].set(cw2.T)
            .at[0, LANE - 1].set(cb2[0, 0]))
    cvec = jnp.concatenate([cb1p, cw2r], axis=0)                   # (2, LANE)
    return (wzh, bias.astype(f32), phi_rep, sel, cw1p, cvec)


def worker_rollout(z_seq, goals_seq, hc0, mask_seq, packed_params):
    """Run the Worker forward over T chained timesteps in ONE pallas_call.

    z_seq:     (T, B, D)      latent per step
    goals_seq: (T, C, B, D)   stacked goals_s list per step
    hc0:       (2, B, H)      initial [h; c]
    mask_seq:  (T, B, 1)      episode-reset mask per step
    Returns (a_seq (T,B,A), u_seq (T,B,H), cx_seq (T,B,H), val_seq (T,B,1)).
    """
    wzh, bias, phi_rep, sel, cw1p, cvec = packed_params
    T, B, D = z_seq.shape
    C = goals_seq.shape[1]
    H = hc0.shape[2]
    A = H // D
    KW, G = wzh.shape                                            # LANE+H, 4H

    grid_spec = pltpu.PrefetchScalarGridSpec(
        num_scalar_prefetch=0,
        grid=(T,),
        in_specs=[
            # Streamed per step (default double-buffered pipeline).
            pl.BlockSpec((None, B, D), lambda t: (t, 0, 0)),          # z_seq
            pl.BlockSpec((None, C, B, D), lambda t: (t, 0, 0, 0)),    # goals
            pl.BlockSpec((None, B, 1), lambda t: (t, 0, 0)),          # mask
            # Resident (constant index_map -> DMA'd once, stays in VMEM).
            pl.BlockSpec((2, B, H), lambda t: (0, 0, 0)),             # hc0
            pl.BlockSpec((KW, G), lambda t: (0, 0)),                  # wzh
            pl.BlockSpec((1, G), lambda t: (0, 0)),                   # bias
            pl.BlockSpec((D, H), lambda t: (0, 0)),                   # phi_rep
            pl.BlockSpec((H, LANE), lambda t: (0, 0)),                # sel
            pl.BlockSpec((H, LANE), lambda t: (0, 0)),                # cw1p
            pl.BlockSpec((2, LANE), lambda t: (0, 0)),                # cvec
        ],
        out_specs=(
            pl.BlockSpec((None, 2, B, H), lambda t: (t, 0, 0, 0)),    # (u, cx)
            pl.BlockSpec((None, B, LANE), lambda t: (t, 0, 0)),       # policy|value
        ),
        scratch_shapes=[
            pltpu.VMEM((2, B, H), jnp.float32),      # carried (h, c)
            pltpu.VMEM((B, KW), jnp.float32),        # fused [z | 0 | h] staging
        ],
    )
    uc_seq, av_seq = pl.pallas_call(
        worker_kernel,
        out_shape=(jax.ShapeDtypeStruct((T, 2, B, H), jnp.float32),
                   jax.ShapeDtypeStruct((T, B, LANE), jnp.float32)),
        grid_spec=grid_spec,
        compiler_params=pltpu.CompilerParams(
            dimension_semantics=("arbitrary",)),     # recurrent time axis
    )(z_seq, goals_seq, mask_seq, hc0, wzh, bias, phi_rep, sel, cw1p, cvec)

    u_seq, cx_seq = uc_seq[:, 0], uc_seq[:, 1]
    a_seq, val_seq = av_seq[:, :, :A], av_seq[:, :, A:A + 1]
    return a_seq, u_seq, cx_seq, val_seq


def worker_step(z, goals_stacked, hc, mask, packed_params):
    """Single-step forward (matches the PyTorch module's forward signature)."""
    a, u, cx, v = worker_rollout(z[None], goals_stacked[None], hc, mask[None],
                                 packed_params)
    return a[0], u[0], cx[0], v[0]


def worker_rollout_ref(z_seq, goals_seq, h0, c0, mask_seq, raw_params):
    """Pure-JAX reference: the PyTorch forward chained over T timesteps."""
    wih, whh, bias, phi, cw1, cb1, cw2, cb2 = raw_params
    T, B, D = z_seq.shape
    H = h0.shape[1]
    A = H // D
    h, c = h0, c0
    a_l, u_l, c_l, v_l = [], [], [], []
    for t in range(T):
        hm, cm = mask_seq[t] * h, mask_seq[t] * c
        gates = z_seq[t] @ wih + hm @ whh + bias
        i = jax.nn.sigmoid(gates[:, :H])
        f = jax.nn.sigmoid(gates[:, H:2 * H])
        g = jnp.tanh(gates[:, 2 * H:3 * H])
        o = jax.nn.sigmoid(gates[:, 3 * H:])
        c = f * cm + i * g
        h = o * jnp.tanh(c)
        w = goals_seq[t].sum(axis=0) @ phi
        val = jnp.maximum(h @ cw1 + cb1, 0.0) @ cw2 + cb2
        logits = jnp.einsum('bk,bka->ba', w, h.reshape(B, D, A))
        a = jax.nn.softmax(logits, axis=-1)
        a_l.append(a); u_l.append(h); c_l.append(c); v_l.append(val)
    return (jnp.stack(a_l), jnp.stack(u_l), jnp.stack(c_l), jnp.stack(v_l))


if __name__ == "__main__":
    # Small, VMEM-friendly sizes consistent with the module.
    B = 8            # batch b
    D = 32           # latent dim d
    A = 4            # num_actions
    H = D * A        # LSTMCell hidden size = d * num_actions = 128
    C = 4            # length of goals_s list (horizon window)
    HID = 50         # critic hidden width
    T = 6            # rollout length (time-grid axis)

    key = jax.random.PRNGKey(0)
    ks = jax.random.split(key, 12)
    f32 = jnp.float32

    # Deterministic synthetic parameters (shapes follow Worker.__init__),
    # stored pre-transposed as (in_features, out_features).
    wih = 0.05 * jax.random.normal(ks[0], (D, 4 * H), f32)     # W_ih^T
    whh = 0.05 * jax.random.normal(ks[1], (H, 4 * H), f32)     # W_hh^T
    bias = 0.05 * jax.random.normal(ks[2], (1, 4 * H), f32)    # b_ih + b_hh
    phi = 0.05 * jax.random.normal(ks[3], (D, D), f32)         # Linear(d,d,bias=False)^T
    cw1 = 0.05 * jax.random.normal(ks[4], (H, HID), f32)       # Linear(H,50)^T
    cb1 = 0.05 * jax.random.normal(ks[5], (1, HID), f32)
    cw2 = 0.05 * jax.random.normal(ks[6], (HID, 1), f32)       # Linear(50,1)^T
    cb2 = 0.05 * jax.random.normal(ks[7], (1, 1), f32)
    raw_params = (wih, whh, bias, phi, cw1, cb1, cw2, cb2)
    packed_params = pack_worker_params(wih, whh, bias, phi, cw1, cb1, cw2, cb2, A)

    # Deterministic example inputs for a T-step rollout.
    z_seq = jax.random.normal(ks[8], (T, B, D), f32)
    goals_seq = jax.random.normal(ks[9], (T, C, B, D), f32)
    h0 = jax.random.normal(ks[10], (B, H), f32)
    c0 = jax.random.normal(ks[11], (B, H), f32)
    mask_seq = jnp.ones((T, B, 1), f32)
    mask_seq = mask_seq.at[0, 1, 0].set(0.0)   # episode resets at various steps
    mask_seq = mask_seq.at[2, 3, 0].set(0.0)
    mask_seq = mask_seq.at[4, 6, 0].set(0.0)
    hc0 = jnp.stack([h0, c0], axis=0)          # (2, B, H)

    a, u, cx, val = jax.block_until_ready(
        worker_rollout(z_seq, goals_seq, hc0, mask_seq, packed_params))

    a_r, u_r, cx_r, val_r = worker_rollout_ref(z_seq, goals_seq, h0, c0,
                                               mask_seq, raw_params)
    assert jnp.allclose(u, u_r, atol=1e-4, rtol=1e-4)
    assert jnp.allclose(cx, cx_r, atol=1e-4, rtol=1e-4)
    assert jnp.allclose(val, val_r, atol=1e-4, rtol=1e-4)
    assert jnp.allclose(a, a_r, atol=1e-3, rtol=1e-3)
    assert a.shape == (T, B, A) and jnp.allclose(a.sum(-1), 1.0, atol=1e-4)

    # Single-step wrapper (module-forward parity) check against step 0.
    a1, u1, cx1, v1 = jax.block_until_ready(
        worker_step(z_seq[0], goals_seq[0], hc0, mask_seq[0], packed_params))
    assert jnp.allclose(u1, u_r[0], atol=1e-4, rtol=1e-4)
    assert jnp.allclose(a1, a_r[0], atol=1e-3, rtol=1e-3)

    print("KERNEL_OK")
</pallas_src>

<mosaic_0001>
module attributes {stable_mosaic.version = 11 : i64} {
  func.func @worker_kernel(%arg0: i32, %arg1: memref<1x8x32xf32, #tpu.memory_space<vmem>>, %arg2: memref<1x4x8x32xf32, #tpu.memory_space<vmem>>, %arg3: memref<1x8x1xf32, #tpu.memory_space<vmem>>, %arg4: memref<2x8x128xf32, #tpu.memory_space<vmem>>, %arg5: memref<256x512xf32, #tpu.memory_space<vmem>>, %arg6: memref<1x512xf32, #tpu.memory_space<vmem>>, %arg7: memref<32x128xf32, #tpu.memory_space<vmem>>, %arg8: memref<128x128xf32, #tpu.memory_space<vmem>>, %arg9: memref<128x128xf32, #tpu.memory_space<vmem>>, %arg10: memref<2x128xf32, #tpu.memory_space<vmem>>, %arg11: memref<1x2x8x128xf32, #tpu.memory_space<vmem>>, %arg12: memref<1x8x128xf32, #tpu.memory_space<vmem>>, %arg13: memref<2x8x128xf32, #tpu.memory_space<vmem>>, %arg14: memref<8x256xf32, #tpu.memory_space<vmem>>) attributes {dimension_semantics = [#tpu.dimension_semantics<arbitrary>], iteration_bounds = array<i64: 6>, scalar_prefetch = 0 : i64, scratch_operands = 2 : i64, tpu.core_type = #tpu.core_type<tc>, window_params = [{transform_indices = @transform_0, window_bounds = array<i64: 1, 8, 32>}, {transform_indices = @transform_1, window_bounds = array<i64: 1, 4, 8, 32>}, {transform_indices = @transform_2, window_bounds = array<i64: 1, 8, 1>}, {pipeline_mode = #tpu.pipeline_mode<synchronous>, transform_indices = @transform_3, window_bounds = array<i64: 2, 8, 128>}, {pipeline_mode = #tpu.pipeline_mode<synchronous>, transform_indices = @transform_4, window_bounds = array<i64: 256, 512>}, {pipeline_mode = #tpu.pipeline_mode<synchronous>, transform_indices = @transform_5, window_bounds = array<i64: 1, 512>}, {pipeline_mode = #tpu.pipeline_mode<synchronous>, transform_indices = @transform_6, window_bounds = array<i64: 32, 128>}, {pipeline_mode = #tpu.pipeline_mode<synchronous>, transform_indices = @transform_7, window_bounds = array<i64: 128, 128>}, {pipeline_mode = #tpu.pipeline_mode<synchronous>, transform_indices = @transform_8, window_bounds = array<i64: 128, 128>}, {pipeline_mode = #tpu.pipeline_mode<synchronous>, transform_indices = @transform_9, window_bounds = array<i64: 2, 128>}, {transform_indices = @transform_10, window_bounds = array<i64: 1, 2, 8, 128>}, {transform_indices = @transform_11, window_bounds = array<i64: 1, 8, 128>}]} {
    %c0_i32 = arith.constant 0 : i32
    %0 = arith.cmpi eq, %arg0, %c0_i32 : i32
    %1 = arith.extui %0 : i1 to i32
    %c0_i32_0 = arith.constant 0 : i32
    %2 = arith.cmpi ne, %1, %c0_i32_0 : i32
    scf.if %2 {
      %c0_68 = arith.constant 0 : index
      %c0_69 = arith.constant 0 : index
      %c0_70 = arith.constant 0 : index
      %119 = vector.load %arg4[%c0_68, %c0_69, %c0_70] : memref<2x8x128xf32, #tpu.memory_space<vmem>>, vector<2x8x128xf32>
      %c0_71 = arith.constant 0 : index
      %c0_72 = arith.constant 0 : index
      %c0_73 = arith.constant 0 : index
      %120 = vector.load %arg13[%c0_71, %c0_72, %c0_73] : memref<2x8x128xf32, #tpu.memory_space<vmem>>, vector<2x8x128xf32>
      tpu.vector_store %arg13[%c0_71, %c0_72, %c0_73], %119 {strides = array<i32>} : memref<2x8x128xf32, #tpu.memory_space<vmem>>, vector<2x8x128xf32>,
      %cst_74 = arith.constant 0.000000e+00 : f32
      %121 = vector.broadcast %cst_74 : f32 to vector<8x256xf32>
      %c0_75 = arith.constant 0 : index
      %c0_76 = arith.constant 0 : index
      %122 = vector.load %arg14[%c0_75, %c0_76] : memref<8x256xf32, #tpu.memory_space<vmem>>, vector<8x256xf32>
      tpu.vector_store %arg14[%c0_75, %c0_76], %121 {strides = array<i32>} : memref<8x256xf32, #tpu.memory_space<vmem>>, vector<8x256xf32>,
    } else {
    }
    %c0 = arith.constant 0 : index
    %c0_1 = arith.constant 0 : index
    %c0_2 = arith.constant 0 : index
    %3 = vector.load %arg3[%c0, %c0_1, %c0_2] : memref<1x8x1xf32, #tpu.memory_space<vmem>>, vector<1x8x1xf32>
    %4 = vector.shape_cast %3 : vector<1x8x1xf32> to vector<8x1xf32>
    %c0_3 = arith.constant 0 : index
    %c0_4 = arith.constant 0 : index
    %c0_5 = arith.constant 0 : index
    %5 = vector.load %arg13[%c0_3, %c0_4, %c0_5] : memref<2x8x128xf32, #tpu.memory_space<vmem>>, vector<1x8x128xf32>
    %6 = vector.shape_cast %5 : vector<1x8x128xf32> to vector<8x128xf32>
    %7 = vector.broadcast %4 : vector<8x1xf32> to vector<8x128xf32>
    %8 = arith.mulf %7, %6 : vector<8x128xf32>
    %c1 = arith.constant 1 : index
    %c0_6 = arith.constant 0 : index
    %c0_7 = arith.constant 0 : index
    %9 = vector.load %arg13[%c1, %c0_6, %c0_7] : memref<2x8x128xf32, #tpu.memory_space<vmem>>, vector<1x8x128xf32>
    %10 = vector.shape_cast %9 : vector<1x8x128xf32> to vector<8x128xf32>
    %11 = vector.broadcast %4 : vector<8x1xf32> to vector<8x128xf32>
    %12 = arith.mulf %11, %10 : vector<8x128xf32>
    %c0_8 = arith.constant 0 : index
    %c0_9 = arith.constant 0 : index
    %c0_10 = arith.constant 0 : index
    %13 = vector.load %arg1[%c0_8, %c0_9, %c0_10] : memref<1x8x32xf32, #tpu.memory_space<vmem>>, vector<1x8x32xf32>
    %14 = vector.shape_cast %13 : vector<1x8x32xf32> to vector<8x32xf32>
    %c0_11 = arith.constant 0 : index
    %c0_12 = arith.constant 0 : index
    %15 = vector.load %arg14[%c0_11, %c0_12] : memref<8x256xf32, #tpu.memory_space<vmem>>, vector<8x32xf32>
    tpu.vector_store %arg14[%c0_11, %c0_12], %14 {strides = array<i32>} : memref<8x256xf32, #tpu.memory_space<vmem>>, vector<8x32xf32>,
    %c0_13 = arith.constant 0 : index
    %c128 = arith.constant 128 : index
    %16 = vector.load %arg14[%c0_13, %c128] : memref<8x256xf32, #tpu.memory_space<vmem>>, vector<8x128xf32>
    tpu.vector_store %arg14[%c0_13, %c128], %8 {strides = array<i32>} : memref<8x256xf32, #tpu.memory_space<vmem>>, vector<8x128xf32>,
    %c0_14 = arith.constant 0 : index
    %c0_15 = arith.constant 0 : index
    %17 = vector.load %arg14[%c0_14, %c0_15] : memref<8x256xf32, #tpu.memory_space<vmem>>, vector<8x256xf32>
    %c0_16 = arith.constant 0 : index
    %c0_17 = arith.constant 0 : index
    %18 = vector.load %arg5[%c0_16, %c0_17] : memref<256x512xf32, #tpu.memory_space<vmem>>, vector<256x512xf32>
    %cst = arith.constant dense<0.000000e+00> : vector<8x512xf32>
    %19 = tpu.matmul %17, %18, %cst {dimension_numbers = #tpu.dot_dimension_numbers<[1], [0], [0], [1], [0, 0, 1, 1], [], []>} : vector<8x256xf32>, vector<256x512xf32>, vector<8x512xf32> -> vector<8x512xf32>
    %c0_18 = arith.constant 0 : index
    %c0_19 = arith.constant 0 : index
    %20 = vector.load %arg6[%c0_18, %c0_19] : memref<1x512xf32, #tpu.memory_space<vmem>>, vector<1x512xf32>
    %21 = vector.broadcast %20 : vector<1x512xf32> to vector<8x512xf32>
    %22 = arith.addf %19, %21 : vector<8x512xf32>
    %23 = vector.extract_strided_slice %22 {offsets = [0, 0], sizes = [8, 128], strides = [1, 1]} : vector<8x512xf32> to vector<8x128xf32>
    %24 = arith.negf %23 : vector<8x128xf32>
    %25 = math.exp %24 : vector<8x128xf32>
    %cst_20 = arith.constant 1.000000e+00 : f32
    %26 = vector.broadcast %cst_20 : f32 to vector<8x128xf32>
    %27 = arith.addf %26, %25 : vector<8x128xf32>
    %28 = arith.divf %26, %27 : vector<8x128xf32>
    %29 = vector.extract_strided_slice %22 {offsets = [0, 128], sizes = [8, 128], strides = [1, 1]} : vector<8x512xf32> to vector<8x128xf32>
    %30 = arith.negf %29 : vector<8x128xf32>
    %31 = math.exp %30 : vector<8x128xf32>
    %cst_21 = arith.constant 1.000000e+00 : f32
    %32 = vector.broadcast %cst_21 : f32 to vector<8x128xf32>
    %33 = arith.addf %32, %31 : vector<8x128xf32>
    %34 = arith.divf %32, %33 : vector<8x128xf32>
    %35 = vector.extract_strided_slice %22 {offsets = [0, 256], sizes = [8, 128], strides = [1, 1]} : vector<8x512xf32> to vector<8x128xf32>
    %36 = math.tanh %35 : vector<8x128xf32>
    %37 = vector.extract_strided_slice %22 {offsets = [0, 384], sizes = [8, 128], strides = [1, 1]} : vector<8x512xf32> to vector<8x128xf32>
    %38 = arith.negf %37 : vector<8x128xf32>
    %39 = math.exp %38 : vector<8x128xf32>
    %cst_22 = arith.constant 1.000000e+00 : f32
    %40 = vector.broadcast %cst_22 : f32 to vector<8x128xf32>
    %41 = arith.addf %40, %39 : vector<8x128xf32>
    %42 = arith.divf %40, %41 : vector<8x128xf32>
    %43 = arith.mulf %34, %12 : vector<8x128xf32>
    %44 = arith.mulf %28, %36 : vector<8x128xf32>
    %45 = arith.addf %43, %44 : vector<8x128xf32>
    %46 = math.tanh %45 : vector<8x128xf32>
    %47 = arith.mulf %42, %46 : vector<8x128xf32>
    %c0_23 = arith.constant 0 : index
    %c0_24 = arith.constant 0 : index
    %c0_25 = arith.constant 0 : index
    %48 = vector.load %arg13[%c0_23, %c0_24, %c0_25] : memref<2x8x128xf32, #tpu.memory_space<vmem>>, vector<1x8x128xf32>
    %49 = vector.shape_cast %48 : vector<1x8x128xf32> to vector<8x128xf32>
    %50 = vector.shape_cast %47 : vector<8x128xf32> to vector<1x8x128xf32>
    tpu.vector_store %arg13[%c0_23, %c0_24, %c0_25], %50 {strides = array<i32>} : memref<2x8x128xf32, #tpu.memory_space<vmem>>, vector<1x8x128xf32>,
    %c1_26 = arith.constant 1 : index
    %c0_27 = arith.constant 0 : index
    %c0_28 = arith.constant 0 : index
    %51 = vector.load %arg13[%c1_26, %c0_27, %c0_28] : memref<2x8x128xf32, #tpu.memory_space<vmem>>, vector<1x8x128xf32>
    %52 = vector.shape_cast %51 : vector<1x8x128xf32> to vector<8x128xf32>
    %53 = vector.shape_cast %45 : vector<8x128xf32> to vector<1x8x128xf32>
    tpu.vector_store %arg13[%c1_26, %c0_27, %c0_28], %53 {strides = array<i32>} : memref<2x8x128xf32, #tpu.memory_space<vmem>>, vector<1x8x128xf32>,
    %c0_29 = arith.constant 0 : index
    %c0_30 = arith.constant 0 : index
    %c0_31 = arith.constant 0 : index
    %c0_32 = arith.constant 0 : index
    %54 = vector.load %arg11[%c0_29, %c0_30, %c0_31, %c0_32] : memref<1x2x8x128xf32, #tpu.memory_space<vmem>>, vector<1x1x8x128xf32>
    %55 = vector.shape_cast %54 : vector<1x1x8x128xf32> to vector<8x128xf32>
    %56 = vector.shape_cast %47 : vector<8x128xf32> to vector<1x1x8x128xf32>
    tpu.vector_store %arg11[%c0_29, %c0_30, %c0_31, %c0_32], %56 {strides = array<i32>} : memref<1x2x8x128xf32, #tpu.memory_space<vmem>>, vector<1x1x8x128xf32>,
    %c0_33 = arith.constant 0 : index
    %c1_34 = arith.constant 1 : index
    %c0_35 = arith.constant 0 : index
    %c0_36 = arith.constant 0 : index
    %57 = vector.load %arg11[%c0_33, %c1_34, %c0_35, %c0_36] : memref<1x2x8x128xf32, #tpu.memory_space<vmem>>, vector<1x1x8x128xf32>
    %58 = vector.shape_cast %57 : vector<1x1x8x128xf32> to vector<8x128xf32>
    %59 = vector.shape_cast %45 : vector<8x128xf32> to vector<1x1x8x128xf32>
    tpu.vector_store %arg11[%c0_33, %c1_34, %c0_35, %c0_36], %59 {strides = array<i32>} : memref<1x2x8x128xf32, #tpu.memory_space<vmem>>, vector<1x1x8x128xf32>,
    %c0_37 = arith.constant 0 : index
    %c0_38 = arith.constant 0 : index
    %c0_39 = arith.constant 0 : index
    %c0_40 = arith.constant 0 : index
    %60 = vector.load %arg2[%c0_37, %c0_38, %c0_39, %c0_40] : memref<1x4x8x32xf32, #tpu.memory_space<vmem>>, vector<1x4x8x32xf32>
    %61 = vector.shape_cast %60 : vector<1x4x8x32xf32> to vector<4x8x32xf32>
    %cst_41 = arith.constant dense<0.000000e+00> : vector<8x32xf32>
    %62 = vector.multi_reduction <add>, %61, %cst_41 [0] : vector<4x8x32xf32> to vector<8x32xf32>
    %c0_42 = arith.constant 0 : index
    %c0_43 = arith.constant 0 : index
    %63 = vector.load %arg7[%c0_42, %c0_43] : memref<32x128xf32, #tpu.memory_space<vmem>>, vector<32x128xf32>
    %cst_44 = arith.constant dense<0.000000e+00> : vector<8x128xf32>
    %64 = tpu.matmul %62, %63, %cst_44 {dimension_numbers = #tpu.dot_dimension_numbers<[1], [0], [0], [1], [0, 0, 1, 1], [], []>} : vector<8x32xf32>, vector<32x128xf32>, vector<8x128xf32> -> vector<8x128xf32>
    %65 = arith.mulf %64, %47 : vector<8x128xf32>
    %c0_45 = arith.constant 0 : index
    %c0_46 = arith.constant 0 : index
    %66 = vector.load %arg8[%c0_45, %c0_46] : memref<128x128xf32, #tpu.memory_space<vmem>>, vector<128x128xf32>
    %cst_47 = arith.constant dense<0.000000e+00> : vector<8x128xf32>
    %67 = tpu.matmul %65, %66, %cst_47 {dimension_numbers = #tpu.dot_dimension_numbers<[1], [0], [0], [1], [0, 0, 1, 1], [], []>} : vector<8x128xf32>, vector<128x128xf32>, vector<8x128xf32> -> vector<8x128xf32>
    %68 = tpu.iota {dimensions = array<i32: 1>} : vector<1x128xi32>
    %c4_i32 = arith.constant 4 : i32
    %69 = vector.broadcast %c4_i32 : i32 to vector<1x128xi32>
    %70 = arith.cmpi slt, %68, %69 : vector<1x128xi32>
    %cst_48 = arith.constant -1.000000e+30 : f32
    %71 = vector.shape_cast %70 : vector<1x128xi1> to vector<1x128xi1>
    %72 = vector.broadcast %71 : vector<1x128xi1> to vector<8x128xi1>
    %73 = vector.broadcast %cst_48 : f32 to vector<8x128xf32>
    %74 = arith.select %72, %67, %73 : vector<8x128xi1>, vector<8x128xf32>
    %cst_49 = arith.constant dense<0xFF800000> : vector<8xf32>
    %75 = vector.multi_reduction <maximumf>, %74, %cst_49 [1] : vector<8x128xf32> to vector<8xf32>
    %76 = vector.shape_cast %75 : vector<8xf32> to vector<8x1xf32>
    %c4_i32_50 = arith.constant 4 : i32
    %77 = vector.broadcast %c4_i32_50 : i32 to vector<1x128xi32>
    %78 = arith.cmpi slt, %68, %77 : vector<1x128xi32>
    %79 = vector.broadcast %76 : vector<8x1xf32> to vector<8x128xf32>
    %80 = arith.subf %74, %79 : vector<8x128xf32>
    %81 = math.exp %80 : vector<8x128xf32>
    %cst_51 = arith.constant 0.000000e+00 : f32
    %82 = vector.shape_cast %78 : vector<1x128xi1> to vector<1x128xi1>
    %83 = vector.broadcast %82 : vector<1x128xi1> to vector<8x128xi1>
    %84 = vector.broadcast %cst_51 : f32 to vector<8x128xf32>
    %85 = arith.select %83, %81, %84 : vector<8x128xi1>, vector<8x128xf32>
    %cst_52 = arith.constant dense<0.000000e+00> : vector<8xf32>
    %86 = vector.multi_reduction <add>, %85, %cst_52 [1] : vector<8x128xf32> to vector<8xf32>
    %87 = vector.shape_cast %86 : vector<8xf32> to vector<8x1xf32>
    %88 = tpu.reciprocal %87 {approx = true} : vector<8x1xf32> -> vector<8x1xf32>
    %89 = arith.mulf %87, %88 : vector<8x1xf32>
    %cst_53 = arith.constant 2.000000e+00 : f32
    %90 = vector.broadcast %cst_53 : f32 to vector<8x1xf32>
    %91 = arith.subf %90, %89 : vector<8x1xf32>
    %92 = arith.mulf %88, %91 : vector<8x1xf32>
    %93 = vector.broadcast %92 : vector<8x1xf32> to vector<8x128xf32>
    %94 = arith.mulf %85, %93 : vector<8x128xf32>
    %c0_54 = arith.constant 0 : index
    %c0_55 = arith.constant 0 : index
    %95 = vector.load %arg10[%c0_54, %c0_55] : memref<2x128xf32, #tpu.memory_space<vmem>>, vector<1x128xf32>
    %c1_56 = arith.constant 1 : index
    %c0_57 = arith.constant 0 : index
    %96 = vector.load %arg10[%c1_56, %c0_57] : memref<2x128xf32, #tpu.memory_space<vmem>>, vector<1x128xf32>
    %c0_58 = arith.constant 0 : index
    %c0_59 = arith.constant 0 : index
    %97 = vector.load %arg9[%c0_58, %c0_59] : memref<128x128xf32, #tpu.memory_space<vmem>>, vector<128x128xf32>
    %cst_60 = arith.constant dense<0.000000e+00> : vector<8x128xf32>
    %98 = tpu.matmul %47, %97, %cst_60 {dimension_numbers = #tpu.dot_dimension_numbers<[1], [0], [0], [1], [0, 0, 1, 1], [], []>} : vector<8x128xf32>, vector<128x128xf32>, vector<8x128xf32> -> vector<8x128xf32>
    %99 = vector.broadcast %95 : vector<1x128xf32> to vector<8x128xf32>
    %100 = arith.addf %98, %99 : vector<8x128xf32>
    %cst_61 = arith.constant 0.000000e+00 : f32
    %101 = vector.broadcast %cst_61 : f32 to vector<8x128xf32>
    %102 = arith.maximumf %100, %101 : vector<8x128xf32>
    %103 = vector.broadcast %96 : vector<1x128xf32> to vector<8x128xf32>
    %104 = arith.mulf %102, %103 : vector<8x128xf32>
    %cst_62 = arith.constant dense<0.000000e+00> : vector<8xf32>
    %105 = vector.multi_reduction <add>, %104, %cst_62 [1] : vector<8x128xf32> to vector<8xf32>
    %106 = vector.shape_cast %105 : vector<8xf32> to vector<8x1xf32>
    %c4_i32_63 = arith.constant 4 : i32
    %107 = vector.broadcast %c4_i32_63 : i32 to vector<1x128xi32>
    %108 = arith.cmpi eq, %68, %107 : vector<1x128xi32>
    %cst_64 = arith.constant 0.000000e+00 : f32
    %109 = vector.shape_cast %108 : vector<1x128xi1> to vector<1x128xi1>
    %110 = vector.broadcast %109 : vector<1x128xi1> to vector<8x128xi1>
    %111 = vector.shape_cast %106 : vector<8x1xf32> to vector<8x1xf32>
    %112 = vector.broadcast %111 : vector<8x1xf32> to vector<8x128xf32>
    %113 = vector.broadcast %cst_64 : f32 to vector<8x128xf32>
    %114 = arith.select %110, %112, %113 : vector<8x128xi1>, vector<8x128xf32>
    %115 = arith.addf %94, %114 : vector<8x128xf32>
    %c0_65 = arith.constant 0 : index
    %c0_66 = arith.constant 0 : index
    %c0_67 = arith.constant 0 : index
    %116 = vector.load %arg12[%c0_65, %c0_66, %c0_67] : memref<1x8x128xf32, #tpu.memory_space<vmem>>, vector<1x8x128xf32>
    %117 = vector.shape_cast %116 : vector<1x8x128xf32> to vector<8x128xf32>
    %118 = vector.shape_cast %115 : vector<8x128xf32> to vector<1x8x128xf32>
    tpu.vector_store %arg12[%c0_65, %c0_66, %c0_67], %118 {strides = array<i32>} : memref<1x8x128xf32, #tpu.memory_space<vmem>>, vector<1x8x128xf32>,
    return
  }
  func.func @transform_0(%arg0: i32) -> (i32, i32, i32) {
    %c0_i32 = arith.constant 0 : i32
    %c0_i32_0 = arith.constant 0 : i32
    %c0_i32_1 = arith.constant 0 : i32
    return %arg0, %c0_i32, %c0_i32_0 : i32, i32, i32
  }
  func.func @transform_1(%arg0: i32) -> (i32, i32, i32, i32) {
    %c0_i32 = arith.constant 0 : i32
    %c0_i32_0 = arith.constant 0 : i32
    %c0_i32_1 = arith.constant 0 : i32
    %c0_i32_2 = arith.constant 0 : i32
    return %arg0, %c0_i32, %c0_i32_0, %c0_i32_1 : i32, i32, i32, i32
  }
  func.func @transform_2(%arg0: i32) -> (i32, i32, i32) {
    %c0_i32 = arith.constant 0 : i32
    %c0_i32_0 = arith.constant 0 : i32
    %c0_i32_1 = arith.constant 0 : i32
    return %arg0, %c0_i32, %c0_i32_0 : i32, i32, i32
  }
  func.func @transform_3(%arg0: i32) -> (i32, i32, i32) {
    %c0_i32 = arith.constant 0 : i32
    %c0_i32_0 = arith.constant 0 : i32
    %c0_i32_1 = arith.constant 0 : i32
    %c0_i32_2 = arith.constant 0 : i32
    return %c0_i32, %c0_i32_0, %c0_i32_1 : i32, i32, i32
  }
  func.func @transform_4(%arg0: i32) -> (i32, i32) {
    %c0_i32 = arith.constant 0 : i32
    %c0_i32_0 = arith.constant 0 : i32
    %c0_i32_1 = arith.constant 0 : i32
    return %c0_i32, %c0_i32_0 : i32, i32
  }
  func.func @transform_5(%arg0: i32) -> (i32, i32) {
    %c0_i32 = arith.constant 0 : i32
    %c0_i32_0 = arith.constant 0 : i32
    %c0_i32_1 = arith.constant 0 : i32
    return %c0_i32, %c0_i32_0 : i32, i32
  }
  func.func @transform_6(%arg0: i32) -> (i32, i32) {
    %c0_i32 = arith.constant 0 : i32
    %c0_i32_0 = arith.constant 0 : i32
    %c0_i32_1 = arith.constant 0 : i32
    return %c0_i32, %c0_i32_0 : i32, i32
  }
  func.func @transform_7(%arg0: i32) -> (i32, i32) {
    %c0_i32 = arith.constant 0 : i32
    %c0_i32_0 = arith.constant 0 : i32
    %c0_i32_1 = arith.constant 0 : i32
    return %c0_i32, %c0_i32_0 : i32, i32
  }
  func.func @transform_8(%arg0: i32) -> (i32, i32) {
    %c0_i32 = arith.constant 0 : i32
    %c0_i32_0 = arith.constant 0 : i32
    %c0_i32_1 = arith.constant 0 : i32
    return %c0_i32, %c0_i32_0 : i32, i32
  }
  func.func @transform_9(%arg0: i32) -> (i32, i32) {
    %c0_i32 = arith.constant 0 : i32
    %c0_i32_0 = arith.constant 0 : i32
    %c0_i32_1 = arith.constant 0 : i32
    return %c0_i32, %c0_i32_0 : i32, i32
  }
  func.func @transform_10(%arg0: i32) -> (i32, i32, i32, i32) {
    %c0_i32 = arith.constant 0 : i32
    %c0_i32_0 = arith.constant 0 : i32
    %c0_i32_1 = arith.constant 0 : i32
    %c0_i32_2 = arith.constant 0 : i32
    return %arg0, %c0_i32, %c0_i32_0, %c0_i32_1 : i32, i32, i32, i32
  }
  func.func @transform_11(%arg0: i32) -> (i32, i32, i32) {
    %c0_i32 = arith.constant 0 : i32
    %c0_i32_0 = arith.constant 0 : i32
    %c0_i32_1 = arith.constant 0 : i32
    return %arg0, %c0_i32, %c0_i32_0 : i32, i32, i32
  }
}

</mosaic_0001>

<bundles_post_ra>
// kernel: tpu_custom_call.1
= control target key start
LH: loop header
LB: loop body
LE: loop exit
PB: predicated region body
PF: predicated region fallthrough
CT: control target
= control target key end

     0   :  { %s2074_s0 = inlined_call_operand.vmem [shape: f32[6,8,32], index: 0, kind: input, shape index: {}]   ;;  %s2075_s1 = inlined_call_operand.hbm [shape: f32[6,4,8,32], index: 1, kind: input, shape index: {}]   ;;  %s2076_s2 = inlined_call_operand.vmem [shape: f32[6,8,1], index: 2, kind: input, shape index: {}]   ;;  %s2077_s3 = inlined_call_operand.hbm [shape: f32[2,8,128], index: 3, kind: input, shape index: {}]   ;;  %s2078_s4 = inlined_call_operand.hbm [shape: f32[256,512], index: 4, kind: input, shape index: {}]   ;;  %s2079_s5 = inlined_call_operand.vmem [shape: f32[1,512], index: 5, kind: input, shape index: {}]   ;;  %s2080_s6 = inlined_call_operand.hbm [shape: f32[32,128], index: 6, kind: input, shape index: {}]   ;;  %s2081_s7 = inlined_call_operand.hbm [shape: f32[128,128], index: 7, kind: input, shape index: {}]   ;;  %s2082_s8 = inlined_call_operand.hbm [shape: f32[128,128], index: 8, kind: input, shape index: {}]   ;;  %s2083_s9 = inlined_call_operand.vmem [shape: f32[2,128], index: 9, kind: input, shape index: {}]   ;;  %s2084_s10 = inlined_call_operand.hbm [shape: f32[6,2,8,128], index: 10, kind: output, shape index: {0}]   ;;  %s2085_s11 = inlined_call_operand.hbm [shape: f32[6,8,128], index: 11, kind: output, shape index: {1}]  }
   0x1   :  { %2088 = sst [smem:[#allocation24_spill]] %s2077_s3 }
   0x2   :  { %2089 = sst [smem:[#allocation25_spill]] %s2078_s4 }
   0x3   :  { %2090 = sst [smem:[#allocation26_spill]] %s2080_s6 }
   0x4   :  { %2091 = sst [smem:[#allocation27_spill]] %s2081_s7 }
   0x5   :  { %2092 = sst [smem:[#allocation28_spill]] %s2082_s8 }
   0x6   :  { %17 = vsyncpa [#allocation5], 0 }
   0x7   :  { %19 = vsyncpa [#allocation5 + $0x1], 0 }
   0x8   :  { %20 = vsyncpa [#allocation8], 0 }
   0x9   :  { %21 = vsyncpa [#allocation11], 0 }
   0xa   :  { %22 = vsyncpa [#allocation14], 0 }
   0xb   :  { %23 = vsyncpa [#allocation6], 0 }
   0xc   :  { %25 = vsyncpa [#allocation6 + $0x1], 0 }
   0xd   :  { %26 = vsyncpa [#allocation17], 0 }
   0xe   :  { %28 = vsyncpa [#allocation17 + $0x1], 0  ;;  %s1820_s17 = smov 0   ;;  %s1822_s18 = smov 0  }
   0xf   :  { %s1824_s19 = smov 0   ;;  %s1826_s20 = smov 0  }
  0x10 LB: > { %s2093_s3 = sld [smem:[#allocation24_spill]]  ;;  %s1844_s24 = sadd.s32 4294967295, %s1745_s20   ;;  %s1745_s20 = sphi %s1826_s20, %s2110_s20   ;;  %s1741_s19 = sphi %s1824_s19, %s2109_s19   ;;  %s1737_s18 = sphi %s1822_s18, %s2108_s18   ;;  %s1733_s17 = sphi %s1820_s17, %s2107_s17  }
  0x11   : > { %p1286_p0 = scmp.ge.s32.totalorder %s1745_s20, 1  ;;  %p81_p1 = scmp.eq.s32.totalorder %s1844_s24, 0 }
  0x12   : > { %p316_p2 = scmp.lt.s32.totalorder %s1745_s20, 7  ;;  %s1747_s26 = smov [#allocation7]  }
  0x13   : > { %s329_s27 = sshll.u32 %s1747_s26, 4  ;;  %s2095_s6 = sld [smem:[#allocation26_spill]]  ;;  %s330_s27 = int_to_ptr.vmem [resolvable:$true] %s329_s27 }
  0x14   : > { %p1850_p4 = pnand %p1286_p0, %p316_p2  ;;  %s2097_s4 = sld [smem:[#allocation25_spill]] }
  0x15   : > { %s1748_s16 = smov [#allocation10]   ;;  %s2086_s22 = smov 128  }
  0x16   : > { %s327_s23 = sshll.u32 %s2093_s3, 4  ;;  %p1348_p5 = pneg %p1850_p4  ;;  %s328_s23 = int_to_ptr.hbm [resolvable:$true] %s327_s23 }
  0x17   : > { %s360_s21 = sshll.u32 %s1748_s16, 4  ;;  %s2087_s26 = smov 8   ;;  %s361_s21 = int_to_ptr.vmem [resolvable:$true] %s360_s21 }
  0x18   : > { %p1861_p6 = pnand %p1348_p5, %p81_p1  ;;  %s1751_s28 = smov [#allocation9]  }
  0x19   : > { %s358_s30 = sshll.u32 %s2095_s6, 4  ;;  %s343_s29 = sshll.u32 %s1751_s28, 4  ;;  %s359_s30 = int_to_ptr.hbm [resolvable:$true] %s358_s30  ;;  %s344_s29 = int_to_ptr.vmem [resolvable:$true] %s343_s29 }
  0x1a   : > { %s341_s15 = sshll.u32 %s2097_s4, 4  ;;  %s2098_s7 = sld [smem:[#allocation27_spill]]  ;;  %s342_s15 = int_to_ptr.hbm [resolvable:$true] %s341_s15 }
  0x1b   : > { %1351 = dma.hbm_to_vmem [thread:$0]  (!%p1861_p6), %s328_s23, 256, %s330_s27, [#allocation8], %s2086_s22, %s2086_s22, %s2087_s26  }
  0x1c   : > { %1357 = dma.hbm_to_vmem [thread:$0]  (!%p1861_p6), %s359_s30, 512, %s361_s21, [#allocation11], %s2086_s22, %s2086_s22, %s2087_s26  }
  0x1d   : > { %s1752_s3 = smov 512   ;;  %s1753_s23 = smov 32  }
  0x1e   : > { %1354 = dma.hbm_to_vmem [thread:$0]  (!%p1861_p6), %s342_s15, 16384, %s344_s29, [#allocation8], %s1752_s3, %s1752_s3, %s1753_s23  }
  0x1f   : > { %s1754_s27 = smov [#allocation12]   ;;  %s2099_s8 = sld [smem:[#allocation28_spill]] }
  0x20   : > { %s372_s16 = sshll.u32 %s2098_s7, 4  ;;  %s374_s30 = sshll.u32 %s1754_s27, 4  ;;  %s373_s16 = int_to_ptr.hbm [resolvable:$true] %s372_s16  ;;  %s375_s30 = int_to_ptr.vmem [resolvable:$true] %s374_s30 }
  0x21   : > { %1360 = dma.hbm_to_vmem [thread:$0]  (!%p1861_p6), %s373_s16, 2048, %s375_s30, [#allocation11], %s2086_s22, %s2086_s22, %s2087_s26  }
  0x22   : > { %s1755_s3 = smov [#allocation13]   ;;  %s1285_s29 = sadd.s32 4294967294, %s1745_s20  }
  0x23   : > { %s388_s15 = sshll.u32 %s1755_s3, 4  ;;  %s1898_s14 = sadd.s32 1, %s1745_s20   ;;  %s389_s15 = int_to_ptr.vmem [resolvable:$true] %s388_s15 }
  0x24   : > { %s67_s23 = sadd.s32 1, %s1741_s19  ;;  %s64_s27 = ssub.s32 %s1745_s20, %s1898_s14 }
  0x25   : > { %s386_s13 = sshll.u32 %s2099_s8, 4  ;;  %p74_p7 = scmp.ne.s32.totalorder %s1741_s19, %s1737_s18  ;;  %s387_s13 = int_to_ptr.hbm [resolvable:$true] %s386_s13 }
  0x26   : > { %1363 = dma.hbm_to_vmem [thread:$0]  (!%p1861_p6), %s387_s13, 2048, %s389_s15, [#allocation14], %s2086_s22, %s2086_s22, %s2087_s26  }
  0x27   : > { %p65_p8 = scmp.eq.s32.totalorder %s64_s27, 0  ;;  %p75_p9 = scmp.eq.s32.totalorder %s1745_s20, 0 }
  0x28   : > { %p80_p10 = scmp.ne.s32.totalorder %s1737_s18, %s1733_s17  ;;  %p277_p11 = scmp.eq.s32.totalorder %s1844_s24, 5 }
  0x29   : > { %s1910_s16 = scalar_select %p65_p8, %s1741_s19, %s67_s23  }
  0x2a   : > { %p1914_p12 = por %p81_p1, %p80_p10  ;;  %p1918_p13 = por %p277_p11, %p74_p7 }
  0x2b   : > { %p283_p0 = scmp.eq.s32.totalorder %s1285_s29, 5  ;;  %p76_p2 = por %p75_p9, %p74_p7 }
  0x2c   : > { %s412_s21 = sand.u32 1, %s1741_s19   ;;  %p1380_p6 = scmp.lt.s32.totalorder %s1745_s20, 6 }
  0x2d   : > { %p1923_p5 = por %p283_p0, %p80_p10  ;;  %s1293_s13 = sshll.u32 %s412_s21, 5 }
  0x2e   : > { %s1320_s3 = sshll.u32 %s1745_s20, 5  ;;  %s416_s26 = scalar_lea.vmem [#allocation4], %s1293_s13 }
  0x2f   : > { %s421_s27 = scalar_lea.hbm %s2075_s1, %s1320_s3  ;;  %s424_s4 = sshll.u32 %s416_s26, 4  ;;  %s425_s4 = int_to_ptr.vmem [resolvable:$true] %s424_s4 }
  0x30   : > { %s422_s22 = sshll.u32 %s421_s27, 4  ;;  %p1932_p8 = pnand %p1380_p6, %p76_p2  ;;  %s423_s22 = int_to_ptr.hbm [resolvable:$true] %s422_s22 }
  0x31   : > { %s413_s6 = scalar_lea.sflag [#allocation5], %s412_s21  ;;  %s1605_s7 = sshra.s32 %s423_s22, 4  ;;  %s1606_s7 = int_to_ptr.hbm [resolvable:$true] %s1605_s7 }
  0x32   : > { %s1607_s8 = scalar_lea.hbm %s1606_s7, 32  ;;  %p1609_p9 = pneg %p1932_p8 }
  0x33   : > { %p1608_p7 = scmp.ne.s32.totalorder %s1606_s7, %s1607_s8  ;;  %s1612_s26 = scalar_lea.hbm %s2075_s1, 192 }
  0x34   : > { %p1613_p0 = scmp.lt.s32.totalorder %s1606_s7, %s2075_s1  ;;  %p1614_p2 = scmp.lt.s32.totalorder %s1612_s26, %s1607_s8 }
  0x35   : > { %p1610_p10 = pnand %p1609_p9, %p1608_p7 }
  0x36   : > { %p1615_p6 = por %p1614_p2, %p1613_p0 }
  0x37   : > { %p1611_p11 = pneg %p1610_p10 }
  0x39   : > { %p1616_p3 = pnand %p1615_p6, %p1611_p11 }
  0x3b   : > { %1619 = shalt.err (!%p1616_p3)
}
  0x3c   : > { %s2104_s21 = smov 8   ;;  %s2105_s27 = smov 128  }
  0x3d   : > { %1367 = dma.hbm_to_vmem [thread:$0]  (!%p1932_p8), %s423_s22, 512, %s425_s4, %s413_s6, %s2105_s27, %s2105_s27, %s2104_s21  }
  0x3e   : > { %443 = sbr.rel (%p1850_p4) target bundleno = 774 (0x306), region = 60  ;;  %s1952_s3 = sand.u32 (!%p1850_p4), 1, %s1737_s18  }
  0x3f   : > { %s1297_s7 = sshll.u32 (!%p1850_p4), %s1952_s3, 5  ;;  %s446_s8 = scalar_lea.sflag (!%p1850_p4), [#allocation5], %s1952_s3 }
  0x40   : > { %s1956_s15 = scalar_lea.vmem (!%p1850_p4), [#allocation4], %s1297_s7 }
  0x43   : > { %1708 = dma.done.wait (%p1914_p12), %s446_s8, 512  }
  0x44   : > { %1710 = vsyncadd (%p1914_p12), %s446_s8, 4294966784 }
  0x45   : > { %1712 = dma.done.wait (%p81_p1), [#allocation8], 16640  }
  0x46   : > { %1714 = vsyncadd (%p81_p1), [#allocation8], 4294950656 }
  0x47   : > { %1716 = dma.done.wait (%p81_p1), [#allocation11], 2560  }
  0x48   : > { %1718 = vsyncadd (%p81_p1), [#allocation11], 4294964736 }
  0x49   : > { %1720 = dma.done.wait (%p81_p1), [#allocation14], 2048  }
  0x4a   : > { %1722 = vsyncadd (%p81_p1), [#allocation14], 4294965248  ;;  %s1303_s4 = sshll.u32 %s1952_s3, 4  ;;  %s1304_s6 = sshll.u32 %s1952_s3, 3 }
  0x4b   : > { %p527_p3 = scmp.lt.s32.totalorder %s1844_s24, 5  ;;  %s1986_s27 = scalar_lea.vmem [#allocation15], %s1303_s4 }
  0x4c   : > { %s1988_s7 = scalar_lea.vmem [#allocation16], %s1304_s6  ;;  %p2106_p1 = scmp.ne.s32.totalorder %s1844_s24, 0 }
  0x4d   : > { %s528_s25 = scalar_select %p527_p3, %s1844_s24, 5 }
  0x4e   : > { %538 = sbr.rel (%p2106_p1) target bundleno = 87 (0x57), region = 88 }
  0x4f   : > { %s1305_s22 = sshll.u32 %s528_s25, 3 }
  0x50   : > { %s1981_s26 = scalar_lea.vmem %s2074_s0, %s1305_s22  ;;  %s534_s21 = scalar_lea.vmem %s2076_s2, %s1305_s22 }
  0x53   : > { %v539_v0 = vld [vmem:[#allocation7] sm:$0xff]  ;;  %v540_v1 = vld [vmem:[#allocation7 + $0x8] sm:$0xff]  ;;  %v1756_v2 = vmov 0.0  }
  0x54   : > { %541 = vst [vmem:[#allocation2] sm:$0xff] %v539_v0 }
  0x55   : > { %542 = vst [vmem:[#allocation2 + $0x8] sm:$0xff] %v540_v1 }
  0x56   : > { %543 = vst [vmem:[#allocation3] sm:$0xff] %v1756_v2 }
  0x57 PF: > { %v545_v3 = vld [vmem:[%s534_s21] sm:$0xff]  ;;  %v622_v4 = vld [vmem:[#allocation9 + $0x1e0] sm:$0xff]  ;;  %v623_v5 = vld [vmem:[#allocation9 + $0x1e8] sm:$0xff]  ;;  %v1757_v6 = vmov 0   ;;  %vm557_vm0 = vcmask 261120   ;;  %s1321_s12 = sshll.u32 %s1844_s24, 4 }
  0x58   : > { %1432 = vset.pattern.permute.xlu0 %v1757_v6  ;;  %700 = vmatpush.msra.mxu0 %v622_v4  ;;  %v618_v7 = vld [vmem:[#allocation9 + $0x1c0] sm:$0xff]  ;;  %v619_v9 = vld [vmem:[#allocation9 + $0x1c8] sm:$0xff]  ;;  %v625_v4 = vld [vmem:[#allocation9 + $0x1f8] sm:$0xff]  ;;  %s1089_s13 = scalar_lea.hbm %s2084_s10, %s1321_s12  ;;  %s1090_s23 = sshll.u32 %s1986_s27, 4  ;;  %s1091_s23 = int_to_ptr.vmem [resolvable:$true] %s1090_s23 }
  0x59   : > { %v686_v8 = vld [vmem:[#allocation9 + $0x3e0] sm:$0xff]  ;;  %549 = vperm.xlu0 %1432, %v545_v3   ;;  %740 = vmatpush.msra.mxu2 %v623_v5  ;;  %v687_v10 = vld [vmem:[#allocation9 + $0x3e8] sm:$0xff]  ;;  %v624_v3 = vld [vmem:[#allocation9 + $0x1f0] sm:$0xff]  ;;  %s1092_s21 = sshll.u32 %s1089_s13, 4  ;;  %s1073_s8 = scalar_lea.sflag [#allocation6], %s1952_s3  ;;  %s1093_s21 = int_to_ptr.hbm [resolvable:$true] %s1092_s21 }
  0x5a   : > { %v614_v11 = vld [vmem:[#allocation9 + $0x1a0] sm:$0xff]  ;;  %701 = vmatpush.msra.mxu0 %v618_v7  ;;  %720 = vmatpush.msra.mxu1 %v686_v8  ;;  %v615_v13 = vld [vmem:[#allocation9 + $0x1a8] sm:$0xff]  ;;  %v620_v7 = vld [vmem:[#allocation9 + $0x1d0] sm:$0xff]  ;;  %s1655_s22 = scalar_lea.hbm %s2084_s10, 96 }
  0x5b   : > { %v682_v12 = vld [vmem:[#allocation9 + $0x3c0] sm:$0xff]  ;;  %v683_v14 = vld [vmem:[#allocation9 + $0x3c8] sm:$0xff]  ;;  %741 = vmatpush.msra.mxu2 %v619_v9  ;;  %760 = vmatpush.msra.mxu3 %v687_v10  ;;  %v688_v8 = vld [vmem:[#allocation9 + $0x3f0] sm:$0xff] }
  0x5c   : > { %v610_v15 = vld [vmem:[#allocation9 + $0x180] sm:$0xff]  ;;  %702 = vmatpush.msra.mxu0 %v614_v11  ;;  %721 = vmatpush.msra.mxu1 %v682_v12  ;;  %v611_v17 = vld [vmem:[#allocation9 + $0x188] sm:$0xff]  ;;  %v621_v9 = vld [vmem:[#allocation9 + $0x1d8] sm:$0xff] }
  0x5d   : > { %v678_v16 = vld [vmem:[#allocation9 + $0x3a0] sm:$0xff]  ;;  %v679_v18 = vld [vmem:[#allocation9 + $0x3a8] sm:$0xff]  ;;  %742 = vmatpush.msra.mxu2 %v615_v13  ;;  %761 = vmatpush.msra.mxu3 %v683_v14  ;;  %v689_v10 = vld [vmem:[#allocation9 + $0x3f8] sm:$0xff] }
  0x5e   : > { %v606_v19 = vld [vmem:[#allocation9 + $0x160] sm:$0xff]  ;;  %703 = vmatpush.msra.mxu0 %v610_v15  ;;  %722 = vmatpush.msra.mxu1 %v678_v16  ;;  %v607_v21 = vld [vmem:[#allocation9 + $0x168] sm:$0xff]  ;;  %v616_v11 = vld [vmem:[#allocation9 + $0x1b0] sm:$0xff] }
  0x5f   : > { %v674_v20 = vld [vmem:[#allocation9 + $0x380] sm:$0xff]  ;;  %v675_v22 = vld [vmem:[#allocation9 + $0x388] sm:$0xff]  ;;  %743 = vmatpush.msra.mxu2 %v611_v17  ;;  %762 = vmatpush.msra.mxu3 %v679_v18  ;;  %v684_v12 = vld [vmem:[#allocation9 + $0x3d0] sm:$0xff] }
  0x60   : > { %v602_v23 = vld [vmem:[#allocation9 + $0x140] sm:$0xff]  ;;  %704 = vmatpush.msra.mxu0 %v606_v19  ;;  %723 = vmatpush.msra.mxu1 %v674_v20  ;;  %v603_v25 = vld [vmem:[#allocation9 + $0x148] sm:$0xff]  ;;  %v617_v13 = vld [vmem:[#allocation9 + $0x1b8] sm:$0xff] }
  0x61   : > { %v670_v24 = vld [vmem:[#allocation9 + $0x360] sm:$0xff]  ;;  %v671_v26 = vld [vmem:[#allocation9 + $0x368] sm:$0xff]  ;;  %744 = vmatpush.msra.mxu2 %v607_v21  ;;  %763 = vmatpush.msra.mxu3 %v675_v22  ;;  %v685_v14 = vld [vmem:[#allocation9 + $0x3d8] sm:$0xff] }
  0x62   : > { %v598_v27 = vld [vmem:[#allocation9 + $0x120] sm:$0xff]  ;;  %705 = vmatpush.msra.mxu0 %v602_v23  ;;  %724 = vmatpush.msra.mxu1 %v670_v24  ;;  %v599_v29 = vld [vmem:[#allocation9 + $0x128] sm:$0xff]  ;;  %v612_v15 = vld [vmem:[#allocation9 + $0x190] sm:$0xff] }
  0x63   : > { %v666_v28 = vld [vmem:[#allocation9 + $0x340] sm:$0xff]  ;;  %v667_v30 = vld [vmem:[#allocation9 + $0x348] sm:$0xff]  ;;  %745 = vmatpush.msra.mxu2 %v603_v25  ;;  %764 = vmatpush.msra.mxu3 %v671_v26  ;;  %v680_v16 = vld [vmem:[#allocation9 + $0x3b0] sm:$0xff] }
  0x64   : > { %v594_v31 = vld [vmem:[#allocation9 + $0x100] sm:$0xff]  ;;  %706 = vmatpush.msra.mxu0 %v598_v27  ;;  %725 = vmatpush.msra.mxu1 %v666_v28  ;;  %v595_v33 = vld [vmem:[#allocation9 + $0x108] sm:$0xff]  ;;  %v613_v17 = vld [vmem:[#allocation9 + $0x198] sm:$0xff] }
  0x65   : > { %v662_v32 = vld [vmem:[#allocation9 + $0x320] sm:$0xff]  ;;  %v663_v34 = vld [vmem:[#allocation9 + $0x328] sm:$0xff]  ;;  %746 = vmatpush.msra.mxu2 %v599_v29  ;;  %765 = vmatpush.msra.mxu3 %v667_v30  ;;  %v681_v18 = vld [vmem:[#allocation9 + $0x3b8] sm:$0xff] }
  0x66   : > { %v590_v35 = vld [vmem:[#allocation9 + $0xe0] sm:$0xff]  ;;  %707 = vmatpush.msra.mxu0 %v594_v31  ;;  %726 = vmatpush.msra.mxu1 %v662_v32  ;;  %v591_v37 = vld [vmem:[#allocation9 + $0xe8] sm:$0xff]  ;;  %v608_v19 = vld [vmem:[#allocation9 + $0x170] sm:$0xff] }
  0x67   : > { %v658_v36 = vld [vmem:[#allocation9 + $0x300] sm:$0xff]  ;;  %v659_v38 = vld [vmem:[#allocation9 + $0x308] sm:$0xff]  ;;  %747 = vmatpush.msra.mxu2 %v595_v33  ;;  %766 = vmatpush.msra.mxu3 %v663_v34  ;;  %v676_v20 = vld [vmem:[#allocation9 + $0x390] sm:$0xff] }
  0x68   : > { %v586_v39 = vld [vmem:[#allocation9 + $0xc0] sm:$0xff]  ;;  %708 = vmatpush.msra.mxu0 %v590_v35  ;;  %727 = vmatpush.msra.mxu1 %v658_v36  ;;  %v587_v41 = vld [vmem:[#allocation9 + $0xc8] sm:$0xff]  ;;  %v609_v21 = vld [vmem:[#allocation9 + $0x178] sm:$0xff] }
  0x69   : > { %v654_v40 = vld [vmem:[#allocation9 + $0x2e0] sm:$0xff]  ;;  %v655_v42 = vld [vmem:[#allocation9 + $0x2e8] sm:$0xff]  ;;  %748 = vmatpush.msra.mxu2 %v591_v37  ;;  %767 = vmatpush.msra.mxu3 %v659_v38  ;;  %v677_v22 = vld [vmem:[#allocation9 + $0x398] sm:$0xff] }
  0x6a   : > { %v582_v43 = vld [vmem:[#allocation9 + $0xa0] sm:$0xff]  ;;  %709 = vmatpush.msra.mxu0 %v586_v39  ;;  %728 = vmatpush.msra.mxu1 %v654_v40  ;;  %v583_v45 = vld [vmem:[#allocation9 + $0xa8] sm:$0xff]  ;;  %v604_v23 = vld [vmem:[#allocation9 + $0x150] sm:$0xff] }
  0x6b   : > { %v650_v44 = vld [vmem:[#allocation9 + $0x2c0] sm:$0xff]  ;;  %v651_v46 = vld [vmem:[#allocation9 + $0x2c8] sm:$0xff]  ;;  %749 = vmatpush.msra.mxu2 %v587_v41  ;;  %768 = vmatpush.msra.mxu3 %v655_v42  ;;  %v672_v24 = vld [vmem:[#allocation9 + $0x370] sm:$0xff] }
  0x6c   : > { %v578_v47 = vld [vmem:[#allocation9 + $0x80] sm:$0xff]  ;;  %710 = vmatpush.msra.mxu0 %v582_v43  ;;  %729 = vmatpush.msra.mxu1 %v650_v44  ;;  %v579_v49 = vld [vmem:[#allocation9 + $0x88] sm:$0xff]  ;;  %v605_v25 = vld [vmem:[#allocation9 + $0x158] sm:$0xff] }
  0x6d   : > { %v646_v48 = vld [vmem:[#allocation9 + $0x2a0] sm:$0xff]  ;;  %v647_v50 = vld [vmem:[#allocation9 + $0x2a8] sm:$0xff]  ;;  %750 = vmatpush.msra.mxu2 %v583_v45  ;;  %769 = vmatpush.msra.mxu3 %v651_v46  ;;  %v673_v26 = vld [vmem:[#allocation9 + $0x378] sm:$0xff] }
  0x6e   : > { %v574_v51 = vld [vmem:[#allocation9 + $0x60] sm:$0xff]  ;;  %711 = vmatpush.msra.mxu0 %v578_v47  ;;  %730 = vmatpush.msra.mxu1 %v646_v48  ;;  %v575_v53 = vld [vmem:[#allocation9 + $0x68] sm:$0xff]  ;;  %v600_v27 = vld [vmem:[#allocation9 + $0x130] sm:$0xff] }
  0x6f   : > { %v642_v52 = vld [vmem:[#allocation9 + $0x280] sm:$0xff]  ;;  %v643_v54 = vld [vmem:[#allocation9 + $0x288] sm:$0xff]  ;;  %751 = vmatpush.msra.mxu2 %v579_v49  ;;  %770 = vmatpush.msra.mxu3 %v647_v50  ;;  %v668_v28 = vld [vmem:[#allocation9 + $0x350] sm:$0xff] }
  0x70   : > { %v570_v55 = vld [vmem:[#allocation9 + $0x40] sm:$0xff]  ;;  %712 = vmatpush.msra.mxu0 %v574_v51  ;;  %731 = vmatpush.msra.mxu1 %v642_v52  ;;  %v571_v57 = vld [vmem:[#allocation9 + $0x48] sm:$0xff]  ;;  %v601_v29 = vld [vmem:[#allocation9 + $0x138] sm:$0xff] }
  0x71   : > { %v638_v56 = vld [vmem:[#allocation9 + $0x260] sm:$0xff]  ;;  %v639_v58 = vld [vmem:[#allocation9 + $0x268] sm:$0xff]  ;;  %752 = vmatpush.msra.mxu2 %v575_v53  ;;  %771 = vmatpush.msra.mxu3 %v643_v54  ;;  %v669_v30 = vld [vmem:[#allocation9 + $0x358] sm:$0xff] }
  0x72   : > { %v566_v59 = vld [vmem:[#allocation9 + $0x20] sm:$0xff]  ;;  %713 = vmatpush.msra.mxu0 %v570_v55  ;;  %732 = vmatpush.msra.mxu1 %v638_v56  ;;  %v567_v61 = vld [vmem:[#allocation9 + $0x28] sm:$0xff]  ;;  %v596_v31 = vld [vmem:[#allocation9 + $0x110] sm:$0xff] }
  0x73   : > { %v634_v60 = vld [vmem:[#allocation9 + $0x240] sm:$0xff]  ;;  %v635_v62 = vld [vmem:[#allocation9 + $0x248] sm:$0xff]  ;;  %753 = vmatpush.msra.mxu2 %v571_v57  ;;  %772 = vmatpush.msra.mxu3 %v639_v58  ;;  %v664_v32 = vld [vmem:[#allocation9 + $0x330] sm:$0xff] }
  0x74   : > { %v562_v63 = vld [vmem:[#allocation9] sm:$0xff]  ;;  %714 = vmatpush.msra.mxu0 %v566_v59  ;;  %733 = vmatpush.msra.mxu1 %v634_v60  ;;  %v563_v1 = vld [vmem:[#allocation9 + $0x8] sm:$0xff]  ;;  %v597_v33 = vld [vmem:[#allocation9 + $0x118] sm:$0xff] }
  0x75   : > { %v630_v0 = vld [vmem:[#allocation9 + $0x220] sm:$0xff]  ;;  %v631_v2 = vld [vmem:[#allocation9 + $0x228] sm:$0xff]  ;;  %754 = vmatpush.msra.mxu2 %v567_v61  ;;  %773 = vmatpush.msra.mxu3 %v635_v62  ;;  %v665_v34 = vld [vmem:[#allocation9 + $0x338] sm:$0xff] }
  0x76   : > { %715 = vmatpush.msra.mxu0 %v562_v63  ;;  %734 = vmatpush.msra.mxu1 %v630_v0  ;;  %v626_v5 = vld [vmem:[#allocation9 + $0x200] sm:$0xff]  ;;  %v627_v6 = vld [vmem:[#allocation9 + $0x208] sm:$0xff]  ;;  %v556_v35 = vld [vmem:[%s1981_s26] sm:$0xff] }
  0x77   : > { %755 = vmatpush.msra.mxu2 %v563_v1  ;;  %774 = vmatpush.msra.mxu3 %v631_v2  ;;  %v592_v36 = vld [vmem:[#allocation9 + $0xf0] sm:$0xff]  ;;  %v593_v38 = vld [vmem:[#allocation9 + $0xf8] sm:$0xff]  ;;  %558 = vst.msk [vmem:[#allocation3] sm:$0xff] %vm557_vm0, %v556_v35  ;;  %v979_v35 = vld [vmem:[#allocation12 + $0x60] sm:$0xff] }
  0x78   : > { %780 = vmatpush.msrb.mxu0 %v624_v3  ;;  %735 = vmatpush.msra.mxu1 %v626_v5  ;;  %v660_v37 = vld [vmem:[#allocation9 + $0x310] sm:$0xff]  ;;  %v661_v39 = vld [vmem:[#allocation9 + $0x318] sm:$0xff] }
  0x79   : > { %820 = vmatpush.msrb.mxu2 %v625_v4  ;;  %775 = vmatpush.msra.mxu3 %v627_v6  ;;  %v588_v40 = vld [vmem:[#allocation9 + $0xd0] sm:$0xff]  ;;  %v589_v42 = vld [vmem:[#allocation9 + $0xd8] sm:$0xff] }
  0x7a   : > { %781 = vmatpush.msrb.mxu0 %v620_v7  ;;  %800 = vmatpush.msrb.mxu1 %v688_v8  ;;  %v656_v41 = vld [vmem:[#allocation9 + $0x2f0] sm:$0xff]  ;;  %v657_v43 = vld [vmem:[#allocation9 + $0x2f8] sm:$0xff] }
  0x7b   : > { %821 = vmatpush.msrb.mxu2 %v621_v9  ;;  %840 = vmatpush.msrb.mxu3 %v689_v10  ;;  %v584_v44 = vld [vmem:[#allocation9 + $0xb0] sm:$0xff]  ;;  %v585_v46 = vld [vmem:[#allocation9 + $0xb8] sm:$0xff] }
  0x7c   : > { %782 = vmatpush.msrb.mxu0 %v616_v11  ;;  %801 = vmatpush.msrb.mxu1 %v684_v12  ;;  %v652_v45 = vld [vmem:[#allocation9 + $0x2d0] sm:$0xff]  ;;  %v653_v47 = vld [vmem:[#allocation9 + $0x2d8] sm:$0xff]  ;;  %v930_v11 = vld [vmem:[%s1956_s15 + $0x10] sm:$0xff] }
  0x7d   : > { %822 = vmatpush.msrb.mxu2 %v617_v13  ;;  %841 = vmatpush.msrb.mxu3 %v685_v14  ;;  %v580_v48 = vld [vmem:[#allocation9 + $0x90] sm:$0xff]  ;;  %v581_v50 = vld [vmem:[#allocation9 + $0x98] sm:$0xff]  ;;  %v931_v12 = vld [vmem:[%s1956_s15 + $0x18] sm:$0xff] }
  0x7e   : > { %783 = vmatpush.msrb.mxu0 %v612_v15  ;;  %802 = vmatpush.msrb.mxu1 %v680_v16  ;;  %v648_v49 = vld [vmem:[#allocation9 + $0x2b0] sm:$0xff]  ;;  %v649_v51 = vld [vmem:[#allocation9 + $0x2b8] sm:$0xff]  ;;  %v560_v52 = vld [vmem:[#allocation3] sm:$0xff] }
  0x7f   : > { %823 = vmatpush.msrb.mxu2 %v613_v17  ;;  %842 = vmatpush.msrb.mxu3 %v681_v18  ;;  %v576_v53 = vld [vmem:[#allocation9 + $0x70] sm:$0xff]  ;;  %v577_v55 = vld [vmem:[#allocation9 + $0x78] sm:$0xff]  ;;  %v940_v15 = vld [vmem:[#allocation10 + $0x8] sm:$0xff]  ;;  %v935_v17 = vsel %vm557_vm0, %v930_v11, 0.0  ;;  %v937_v18 = vsel %vm557_vm0, %v931_v12, 0.0 }
  0x80   : > { %784 = vmatpush.msrb.mxu0 %v608_v19  ;;  %803 = vmatpush.msrb.mxu1 %v676_v20  ;;  %v644_v54 = vld [vmem:[#allocation9 + $0x290] sm:$0xff]  ;;  %v645_v56 = vld [vmem:[#allocation9 + $0x298] sm:$0xff]  ;;  %v939_v19 = vld [vmem:[#allocation10] sm:$0xff] }
  0x81   : > { %824 = vmatpush.msrb.mxu2 %v609_v21  ;;  %843 = vmatpush.msrb.mxu3 %v677_v22  ;;  %v572_v57 = vld [vmem:[#allocation9 + $0x50] sm:$0xff]  ;;  %v573_v59 = vld [vmem:[#allocation9 + $0x58] sm:$0xff]  ;;  %v968_v12 = vld [vmem:[#allocation12 + $0x8] sm:$0xff] }
  0x82   : > { %785 = vmatpush.msrb.mxu0 %v604_v23  ;;  %804 = vmatpush.msrb.mxu1 %v672_v24  ;;  %v640_v58 = vld [vmem:[#allocation9 + $0x270] sm:$0xff]  ;;  %v641_v60 = vld [vmem:[#allocation9 + $0x278] sm:$0xff] }
  0x83   : > { %825 = vmatpush.msrb.mxu2 %v605_v25  ;;  %844 = vmatpush.msrb.mxu3 %v673_v26  ;;  %v568_v61 = vld [vmem:[#allocation9 + $0x30] sm:$0xff]  ;;  %v569_v63 = vld [vmem:[#allocation9 + $0x38] sm:$0xff] }
  0x84   : > { %786 = vmatpush.msrb.mxu0 %v600_v27  ;;  %805 = vmatpush.msrb.mxu1 %v668_v28  ;;  %v636_v62 = vld [vmem:[#allocation9 + $0x250] sm:$0xff]  ;;  %v637_v0 = vld [vmem:[#allocation9 + $0x258] sm:$0xff] }
  0x85   : > { %826 = vmatpush.msrb.mxu2 %v601_v29  ;;  %845 = vmatpush.msrb.mxu3 %v669_v30  ;;  %v564_v1 = vld [vmem:[#allocation9 + $0x10] sm:$0xff]  ;;  %v565_v3 = vld [vmem:[#allocation9 + $0x18] sm:$0xff]  ;;  %v1037_v30 = vld [vmem:[#allocation13 + $0x68] sm:$0xff] }
  0x86   : > { %787 = vmatpush.msrb.mxu0 %v596_v31  ;;  %806 = vmatpush.msrb.mxu1 %v664_v32  ;;  %v632_v2 = vld [vmem:[#allocation9 + $0x230] sm:$0xff]  ;;  %v633_v4 = vld [vmem:[#allocation9 + $0x238] sm:$0xff]  ;;  %v980_v32 = vld [vmem:[#allocation12 + $0x68] sm:$0xff] }
  0x87   : > { %827 = vmatpush.msrb.mxu2 %v597_v33  ;;  %846 = vmatpush.msrb.mxu3 %v665_v34  ;;  %v628_v5 = vld [vmem:[#allocation9 + $0x210] sm:$0xff]  ;;  %v629_v6 = vld [vmem:[#allocation9 + $0x218] sm:$0xff]  ;;  %v1036_v33 = vld [vmem:[#allocation13 + $0x60] sm:$0xff] }
  0x88   : > { %788 = vmatpush.msrb.mxu0 %v592_v36  ;;  %807 = vmatpush.msrb.mxu1 %v660_v37  ;;  %v942_v7 = vld [vmem:[#allocation10 + $0x18] sm:$0xff]  ;;  %v941_v8 = vld [vmem:[#allocation10 + $0x10] sm:$0xff] }
  0x89   : > { %828 = vmatpush.msrb.mxu2 %v593_v38  ;;  %847 = vmatpush.msrb.mxu3 %v661_v39  ;;  %v928_v9 = vld [vmem:[%s1956_s15] sm:$0xff]  ;;  %v929_v10 = vld [vmem:[%s1956_s15 + $0x8] sm:$0xff]  ;;  %s1649_s15 = sshra.s32 %s1093_s21, 4  ;;  %s1650_s15 = int_to_ptr.hbm [resolvable:$true] %s1649_s15 }
  0x8a   : > { %789 = vmatpush.msrb.mxu0 %v588_v40  ;;  %808 = vmatpush.msrb.mxu1 %v656_v41  ;;  %v932_v13 = vsel %vm557_vm0, %v928_v9, 0.0  ;;  %v933_v14 = vsel %vm557_vm0, %v929_v10, 0.0  ;;  %v546_v22 = vld [vmem:[#allocation2] sm:$0xff]  ;;  %v1039_v25 = vld [vmem:[#allocation13 + $0x78] sm:$0xff]  ;;  %s1651_s4 = scalar_lea.hbm %s1650_s15, 16  ;;  %p1656_p7 = scmp.lt.s32.totalorder %s1650_s15, %s2084_s10 }
  0x8b   : > { %829 = vmatpush.msrb.mxu2 %v589_v42  ;;  %848 = vmatpush.msrb.mxu3 %v657_v43  ;;  %v934_v16 = vadd.f32 %v933_v14, %v932_v13  ;;  %v982_v26 = vld [vmem:[#allocation12 + $0x78] sm:$0xff]  ;;  %v1038_v27 = vld [vmem:[#allocation13 + $0x70] sm:$0xff]  ;;  %v1033_v43 = vld [vmem:[#allocation13 + $0x48] sm:$0xff]  ;;  %p1652_p4 = scmp.ne.s32.totalorder %s1650_s15, %s1651_s4  ;;  %p1657_p9 = scmp.lt.s32.totalorder %s1655_s22, %s1651_s4 }
  0x8c   : > { %790 = vmatpush.msrb.mxu0 %v584_v44  ;;  %809 = vmatpush.msrb.mxu1 %v652_v45  ;;  %v2009_v28 = vld [vmem:[%s2079_s5] sm:$0xf]  ;;  %v1035_v36 = vld [vmem:[#allocation13 + $0x58] sm:$0xff]  ;;  %v1024_v13 = vld [vmem:[#allocation13] sm:$0xff] }
  0x8d   : > { %830 = vmatpush.msrb.mxu2 %v585_v46  ;;  %849 = vmatpush.msrb.mxu3 %v653_v47  ;;  %v936_v20 = vadd.f32 %v935_v17, %v934_v16  ;;  %v981_v29 = vld [vmem:[#allocation12 + $0x70] sm:$0xff]  ;;  %v692_v31 = vperm.slane %v2009_v28, 0  ;;  %v978_v38 = vld [vmem:[#allocation12 + $0x58] sm:$0xff]  ;;  %v693_v41 = vperm.slane %v2009_v28, 1  ;;  %v976_v46 = vld [vmem:[#allocation12 + $0x48] sm:$0xff]  ;;  %p1653_p12 = pnand %p1652_p4, %p1918_p13  ;;  %p1658_p10 = por %p1657_p9, %p1656_p7 }
  0x8e   : > { %791 = vmatpush.msrb.mxu0 %v580_v48  ;;  %810 = vmatpush.msrb.mxu1 %v648_v49  ;;  %v1034_v39 = vld [vmem:[#allocation13 + $0x50] sm:$0xff]  ;;  %v1032_v47 = vld [vmem:[#allocation13 + $0x40] sm:$0xff] }
  0x8f   : > { %831 = vmatpush.msrb.mxu2 %v581_v50  ;;  %850 = vmatpush.msrb.mxu3 %v649_v51  ;;  %v938_v21 = vadd.f32 %v937_v18, %v936_v20  ;;  %v977_v42 = vld [vmem:[#allocation12 + $0x50] sm:$0xff]  ;;  %v975_v50 = vld [vmem:[#allocation12 + $0x40] sm:$0xff]  ;;  %v1031_v51 = vld [vmem:[#allocation13 + $0x38] sm:$0xff]  ;;  %p1654_p8 = pneg %p1653_p12 }
  0x90   : > { %716 = vmatmul.f32.vlgmr.msra.gmra.mxu0 %v560_v52  ;;  %756 = vmatmul.f32.vlgmr.msra.gmra.mxu2 %v560_v52  ;;  %v967_v17 = vld [vmem:[#allocation12] sm:$0xff] }
  0x91   : > { %792 = vmatpush.msrb.mxu0 %v576_v53  ;;  %811 = vmatpush.msrb.mxu1 %v644_v54  ;;  %v1030_v53 = vld [vmem:[#allocation13 + $0x30] sm:$0xff]  ;;  %p1659_p11 = pnand %p1658_p10, %p1654_p8 }
  0x92   : > { %832 = vmatpush.msrb.mxu2 %v577_v55  ;;  %851 = vmatpush.msrb.mxu3 %v645_v56  ;;  %v695_v56 = vperm.slane %v2009_v28, 3 }
  0x93   : > { %793 = vmatpush.msrb.mxu0 %v572_v57  ;;  %812 = vmatpush.msrb.mxu1 %v640_v58  ;;  %v973_v57 = vld [vmem:[#allocation12 + $0x30] sm:$0xff]  ;;  %v1029_v58 = vld [vmem:[#allocation13 + $0x28] sm:$0xff] }
  0x94   : > { %833 = vmatpush.msrb.mxu2 %v573_v59  ;;  %852 = vmatpush.msrb.mxu3 %v641_v60 }
  0x95   : > { %794 = vmatpush.msrb.mxu0 %v568_v61  ;;  %813 = vmatpush.msrb.mxu1 %v636_v62  ;;  %v972_v61 = vld [vmem:[#allocation12 + $0x28] sm:$0xff]  ;;  %v1028_v62 = vld [vmem:[#allocation13 + $0x20] sm:$0xff] }
  0x96   : > { %834 = vmatpush.msrb.mxu2 %v569_v63  ;;  %853 = vmatpush.msrb.mxu3 %v637_v0  ;;  %v971_v63 = vld [vmem:[#allocation12 + $0x20] sm:$0xff]  ;;  %v1027_v0 = vld [vmem:[#allocation13 + $0x18] sm:$0xff] }
  0x97   : > { %795 = vmatpush.msrb.mxu0 %v564_v1  ;;  %814 = vmatpush.msrb.mxu1 %v632_v2 }
  0x98   : > { %835 = vmatpush.msrb.mxu2 %v565_v3  ;;  %854 = vmatpush.msrb.mxu3 %v633_v4  ;;  %v970_v3 = vld [vmem:[#allocation12 + $0x18] sm:$0xff]  ;;  %v1026_v4 = vld [vmem:[#allocation13 + $0x10] sm:$0xff] }
  0x99   : > { %796 = vmatmul.f32.vlgmr.msrb.gmra.mxu0 %v560_v52  ;;  %836 = vmatmul.f32.vlgmr.msrb.gmra.mxu2 %v560_v52  ;;  %v974_v52 = vld [vmem:[#allocation12 + $0x38] sm:$0xff] }
  0x9a   : > { %815 = vmatpush.msrb.mxu1 %v628_v5  ;;  %855 = vmatpush.msrb.mxu3 %v629_v6  ;;  %v969_v6 = vld [vmem:[#allocation12 + $0x10] sm:$0xff] }
  0x9b   : > { %958 = vmatpush.msra.mxu0 %v942_v7  ;;  %1041 = vmatpush.msra.mxu2 %v1039_v25  ;;  %v1025_v7 = vld [vmem:[#allocation13 + $0x8] sm:$0xff] }
  0x9d   : > { %959 = vmatpush.msra.mxu0 %v941_v8  ;;  %1042 = vmatpush.msra.mxu2 %v1038_v27 }
  0x9f   : > { %960 = vmatpush.msra.mxu0 %v940_v15  ;;  %1043 = vmatpush.msra.mxu2 %v1037_v30  ;;  %v694_v15 = vperm.slane %v2009_v28, 2 }
  0xa1   : > { %961 = vmatpush.msra.mxu0 %v939_v19  ;;  %1044 = vmatpush.msra.mxu2 %v1036_v33 }
  0xa2   : > { %1312 = vmatmul.msk.f32.vlgmr.msra.gmra.mxu0 %vm557_vm0, %v938_v21 }
  0xa3   : > { %1045 = vmatpush.msra.mxu2 %v1035_v36 }
  0xa5   : > { %1046 = vmatpush.msra.mxu2 %v1034_v39 }
  0xa7   : > { %1047 = vmatpush.msra.mxu2 %v1033_v43 }
  0xa9   : > { %1048 = vmatpush.msra.mxu2 %v1032_v47 }
  0xab   : > { %1049 = vmatpush.msra.mxu2 %v1031_v51 }
  0xad   : > { %1050 = vmatpush.msra.mxu2 %v1030_v53 }
  0xaf   : > { %1051 = vmatpush.msra.mxu2 %v1029_v58 }
  0xb1   : > { %1052 = vmatpush.msra.mxu2 %v1028_v62 }
  0xb3   : > { %1053 = vmatpush.msra.mxu2 %v1027_v0 }
  0xb5   : > { %1054 = vmatpush.msra.mxu2 %v1026_v4 }
  0xb7   : > { %1055 = vmatpush.msra.mxu2 %v1025_v7 }
  0xb9   : > { %1056 = vmatpush.msra.mxu2 %v1024_v13 }
  0xcb   : > { %v2003_v23 = vpop.permute.xlu0 %549 }
  0xcc   : > { %v552_v24 = vmul.f32 %v2003_v23, %v546_v22 }
  0xce   : > { %736 = vmatmul.f32.vlgmr.msra.gmra.mxu1 %v552_v24  ;;  %776 = vmatmul.f32.vlgmr.msra.gmra.mxu3 %v552_v24 }
  0xcf   : > { %983 = vmatpush.msra.mxu1 %v982_v26 }
  0xd1   : > { %984 = vmatpush.msra.mxu1 %v981_v29 }
  0xd3   : > { %985 = vmatpush.msra.mxu1 %v980_v32 }
  0xd5   : > { %986 = vmatpush.msra.mxu1 %v979_v35 }
  0xd6   : > { %816 = vmatmul.f32.vlgmr.msrb.gmra.mxu1 %v552_v24  ;;  %856 = vmatmul.f32.vlgmr.msrb.gmra.mxu3 %v552_v24 }
  0xd7   : > { %987 = vmatpush.msra.mxu1 %v978_v38  ;;  %v554_v38 = vld [vmem:[#allocation2 + $0x8] sm:$0xff] }
  0xd9   : > { %988 = vmatpush.msra.mxu1 %v977_v42 }
  0xdb   : > { %989 = vmatpush.msra.mxu1 %v976_v46 }
  0xdd   : > { %990 = vmatpush.msra.mxu1 %v975_v50 }
  0xdf   : > { %991 = vmatpush.msra.mxu1 %v974_v52 }
  0xe1   : > { %992 = vmatpush.msra.mxu1 %v973_v57 }
  0xe3   : > { %993 = vmatpush.msra.mxu1 %v972_v61 }
  0xe5   : > { %994 = vmatpush.msra.mxu1 %v971_v63  ;;  %v1003_v63 = vlaneseq }
  0xe7   : > { %995 = vmatpush.msra.mxu1 %v970_v3  ;;  %v1004_v0 = vand.u32 127, %v1003_v63 }
  0xe9   : > { %996 = vmatpush.msra.mxu1 %v969_v6  ;;  %vm1005_vm13 = vcmp.lt.s32.totalorder %v1004_v0, 4  ;;  %v1433_v6 = vld [vmem:[%s2083_s9] ss:$0 sm:$0xff] }
  0xeb   : > { %997 = vmatpush.msra.mxu1 %v968_v12  ;;  %v1434_v12 = vld [vmem:[%s2083_s9 + $0x1] ss:$0 sm:$0xff] }
  0xed   : > { %998 = vmatpush.msra.mxu1 %v967_v17 }
 0x10d   : > { %v717_v34 = vpop.f32.mrf.mxu0 }
 0x10e   : > { %v718_v37 = vadd.f32 %v717_v34, %v692_v31 }
 0x113   : > { %v757_v40 = vpop.f32.mrf.mxu2 }
 0x114   : > { %v758_v49 = vadd.f32 %v757_v40, %v693_v41 }
 0x116   : > { %v797_v16 = vpop.f32.mrf.mxu0 }
 0x117   : > { %v798_v20 = vadd.f32 %v797_v16, %v694_v15 }
 0x11c   : > { %v837_v59 = vpop.f32.mrf.mxu2 }
 0x11d   : > { %v838_v2 = vadd.f32 %v837_v59, %v695_v56 }
 0x14b   : > { %v737_v44 = vpop.f32.mrf.mxu1 }
 0x14c   : > { %v738_v45 = vadd.f32 %v737_v44, %v718_v37  ;;  %v555_v44 = vmul.f32 %v554_v38, %v2003_v23 }
 0x14e   : > { %v1308_v48 = vmul.f32 -1.442695, %v738_v45 }
 0x150   : > { %1435 = vpow2.f32 %v1308_v48 }
 0x151   : > { %v777_v54 = vpop.f32.mrf.mxu3 }
 0x152   : > { %v778_v55 = vadd.f32 %v777_v54, %v758_v49 }
 0x153   : > { %v817_v22 = vpop.f32.mrf.mxu1 }
 0x154   : > { %v1309_v60 = vmul.f32 -1.442695, %v778_v55  ;;  %v818_v27 = vadd.f32 %v817_v22, %v798_v20 }
 0x156   : > { %v1436_v1 = vpop.eup %1435  ;;  %1437 = vpow2.f32 %v1309_v60  ;;  %v963_v60 = vpop.f32.mrf.mxu0 }
 0x157   : > { %v863_v5 = vadd.f32 1.0, %v1436_v1 }
 0x159   : > { %1439 = vrcp.f32 %v863_v5  ;;  %v857_v8 = vpop.f32.mrf.mxu3  ;;  %v875_v28 = vand.u32 2147483648, %v863_v5  ;;  %vm869_vm2 = vweird.f32 %v863_v5  ;;  %v873_v33 = vand.u32 2147483647, %v863_v5 }
 0x15a   : > { %v858_v9 = vadd.f32 %v857_v8, %v838_v2 }
 0x15b   : > { %v876_v39 = vor.u32 1.1754944e-38, %v875_v28  ;;  %vm874_vm6 = vcmp.eq.f32.partialorder %v873_v33, 8.507059e+37 }
 0x15c   : > { %v1438_v10 = vpop.eup %1437  ;;  %v1310_v11 = vmul.f32 -1.442695, %v858_v9 }
 0x15d   : > { %v882_v14 = vadd.f32 1.0, %v1438_v10 }
 0x15e   : > { %1441 = vpow2.f32 %v1310_v11 }
 0x15f   : > { %v1440_v18 = vpop.eup %1439  ;;  %1443 = vrcp.f32 %v882_v14  ;;  %v894_v34 = vand.u32 2147483648, %v882_v14  ;;  %v892_v37 = vand.u32 2147483647, %v882_v14  ;;  %vm888_vm5 = vweird.f32 %v882_v14 }
 0x160   : > { %v865_v19 = vmul.f32 %v1440_v18, %v863_v5  ;;  %vm870_vm1 = vweird.f32 %v1440_v18 }
 0x161   : > { %vm871_vm3 = vmor %vm869_vm2, %vm870_vm1  ;;  %v895_v42 = vor.u32 1.1754944e-38, %v894_v34  ;;  %vm893_vm8 = vcmp.eq.f32.partialorder %v892_v37, 8.507059e+37 }
 0x162   : > { %v866_v21 = vsub.f32 1.0, %v865_v19 }
 0x164   : > { %v1442_v24 = vpop.eup %1441  ;;  %v867_v25 = vmul.f32 %v1440_v18, %v866_v21 }
 0x165   : > { %v1444_v26 = vpop.eup %1443  ;;  %v902_v29 = vadd.f32 1.0, %v1442_v24 }
 0x166   : > { %v884_v30 = vmul.f32 %v1444_v26, %v882_v14  ;;  %v868_v31 = vadd.f32 %v1440_v18, %v867_v25  ;;  %vm889_vm4 = vweird.f32 %v1444_v26 }
 0x167   : > { %1445 = vrcp.f32 %v902_v29  ;;  %vm890_vm7 = vmor %vm888_vm5, %vm889_vm4  ;;  %v914_v55 = vand.u32 2147483648, %v902_v29  ;;  %vm908_vm10 = vweird.f32 %v902_v29  ;;  %v912_v23 = vand.u32 2147483647, %v902_v29 }
 0x168   : > { %v885_v32 = vsub.f32 1.0, %v884_v30  ;;  %1447 = vtanh.f32 %v818_v27  ;;  %v872_v36 = vsel %vm871_vm3, %v1440_v18, %v868_v31 }
 0x169   : > { %v877_v43 = vsel %vm874_vm6, %v876_v39, %v872_v36  ;;  %v915_v57 = vor.u32 1.1754944e-38, %v914_v55  ;;  %vm913_vm12 = vcmp.eq.f32.partialorder %v912_v23, 8.507059e+37 }
 0x16a   : > { %v886_v35 = vmul.f32 %v1444_v26, %v885_v32 }
 0x16c   : > { %v887_v40 = vadd.f32 %v1444_v26, %v886_v35 }
 0x16d   : > { %v1446_v41 = vpop.eup %1445 }
 0x16e   : > { %v891_v45 = vsel %vm890_vm7, %v1444_v26, %v887_v40  ;;  %v904_v46 = vmul.f32 %v1446_v41, %v902_v29  ;;  %v1448_v47 = vpop.eup %1447  ;;  %vm909_vm9 = vweird.f32 %v1446_v41 }
 0x16f   : > { %v896_v48 = vsel %vm893_vm8, %v895_v42, %v891_v45  ;;  %v919_v50 = vmul.f32 %v1448_v47, %v877_v43  ;;  %vm910_vm11 = vmor %vm908_vm10, %vm909_vm9 }
 0x170   : > { %v918_v49 = vmul.f32 %v896_v48, %v555_v44  ;;  %v905_v51 = vsub.f32 1.0, %v904_v46 }
 0x172   : > { %v920_v52 = vadd.f32 %v919_v50, %v918_v49  ;;  %v906_v53 = vmul.f32 %v1446_v41, %v905_v51 }
 0x174   : > { %1449 = vtanh.f32 %v920_v52  ;;  %924 = vst [vmem:[#allocation2 + $0x8] sm:$0xff] %v920_v52  ;;  %v907_v54 = vadd.f32 %v1446_v41, %v906_v53 }
 0x175   : > { %1311 = vst [vmem:[%s1986_s27 + $0x8] sm:$0xff] %v920_v52 }
 0x176   : > { %v911_v56 = vsel %vm910_vm11, %v1446_v41, %v907_v54 }
 0x177   : > { %v916_v59 = vsel %vm913_vm12, %v915_v57, %v911_v56 }
 0x17a   : > { %v1450_v58 = vpop.eup %1449 }
 0x17b   : > { %v922_v61 = vmul.f32 %v1450_v58, %v916_v59 }
 0x17d   : > { %923 = vst [vmem:[#allocation2] sm:$0xff] %v922_v61  ;;  %v966_v62 = vmul.f32 %v963_v60, %v922_v61  ;;  %1057 = vmatmul.f32.vlgmr.msra.gmra.mxu2 %v922_v61 }
 0x17e   : > { %925 = vst [vmem:[%s1986_s27] sm:$0xff] %v922_v61 }
 0x17f   : > { %999 = vmatmul.f32.vlgmr.msra.gmra.mxu1 %v966_v62 }
 0x1fc   : > { %v1000_v1 = vpop.f32.mrf.mxu1 }
 0x1fd   : > { %v1008_v2 = vsel %vm1005_vm13, %v1000_v1, -1e+30 }
 0x1fe   : > { %1009 = vmax.xlane.f32.xlu0 %v1008_v2 }
 0x200   : > { %v1058_v7 = vpop.f32.mrf.mxu2 }
 0x201   : > { %v1059_v9 = vadd.f32 %v1433_v6, %v1058_v7 }
 0x203   : > { %v1061_v11 = vmax.f32 %v1059_v9, 0.0 }
 0x205   : > { %v1063_v13 = vmul.f32 %v1434_v12, %v1061_v11 }
 0x271   : > { %v1010_v3 = vpop.xlane.xlu0 %1009 }
 0x272   : > { %v1011_v4 = vsub.f32 %v1008_v2, %v1010_v3 }
 0x274   : > { %v1012_v5 = vmul.f32 1.442695, %v1011_v4 }
 0x276   : > { %1451 = vpow2.f32 %v1012_v5 }
 0x27c   : > { %v1452_v8 = vpop.eup %1451 }
 0x27d   : > { %v1014_v10 = vsel %vm1005_vm13, %v1452_v8, 0.0 }
 0x27e   : > { %1015 = vadd.xlane.f32.xlu1 %v1014_v10 }
 0x286   : > { %1064 = vadd.xlane.f32.xlu1 %v1063_v13 }
 0x287   : > { %1662 = shalt.err (!%p1659_p11)
}
 0x288   : > { %s1758_s27 = smov 128   ;;  %s1759_s26 = smov 8   ;;  %vm1066_vm14 = vcmp.eq.s32.totalorder %v1004_v0, 4 }
 0x289   : > { %1344 = dma.vmem_to_hbm [thread:$0]  (%p1918_p13), %s1091_s23, 256, %s1093_s21, %s1073_s8, %s1758_s27, %s1758_s27, %s1759_s26  }
 0x28a   : > { %s1317_s13 = sshll.u32 %s1844_s24, 3  ;;  %s1107_s25 = sshll.u32 %s1988_s7, 4  ;;  %s1108_s25 = int_to_ptr.vmem [resolvable:$true] %s1107_s25 }
 0x28b   : > { %s1105_s6 = scalar_lea.hbm %s2085_s11, %s1317_s13  ;;  %s1078_s23 = scalar_lea.sflag [#allocation17], %s1952_s3 }
 0x28c   : > { %s1109_s22 = sshll.u32 %s1105_s6, 4  ;;  %s1683_s12 = scalar_lea.hbm %s2085_s11, 48  ;;  %s1110_s22 = int_to_ptr.hbm [resolvable:$true] %s1109_s22 }
 0x28d   : > { %s1677_s24 = sshra.s32 %s1110_s22, 4  ;;  %s1678_s24 = int_to_ptr.hbm [resolvable:$true] %s1677_s24 }
 0x28e   : > { %s1679_s21 = scalar_lea.hbm %s1678_s24, 8  ;;  %p1684_p3 = scmp.lt.s32.totalorder %s1678_s24, %s2085_s11 }
 0x28f   : > { %p1680_p0 = scmp.ne.s32.totalorder %s1678_s24, %s1679_s21  ;;  %p1685_p1 = scmp.lt.s32.totalorder %s1683_s12, %s1679_s21 }
 0x291   : > { %p1681_p2 = pnand %p1680_p0, %p1918_p13  ;;  %p1686_p4 = por %p1685_p1, %p1684_p3 }
 0x293   : > { %p1682_p6 = pneg %p1681_p2 }
 0x295   : > { %p1687_p12 = pnand %p1686_p4, %p1682_p6 }
 0x2f1   : > { %v1016_v14 = vpop.xlane.xlu1 %1015 }
 0x2f2   : > { %1453 = vrcp.f32 %v1016_v14 }
 0x2f8   : > { %v1454_v15 = vpop.eup %1453 }
 0x2f9   : > { %v1018_v16 = vmul.f32 %v1454_v15, %v1016_v14  ;;  %v1065_v19 = vpop.xlane.xlu1 %1064 }
 0x2fa   : > { %v1069_v21 = vsel %vm1066_vm14, %v1065_v19, 0.0 }
 0x2fb   : > { %v1019_v17 = vsub.f32 2.0, %v1018_v16 }
 0x2fd   : > { %v1020_v18 = vmul.f32 %v1454_v15, %v1019_v17 }
 0x2ff   : > { %v1021_v20 = vmul.f32 %v1020_v18, %v1014_v10 }
 0x301   : > { %v1070_v22 = vadd.f32 %v1069_v21, %v1021_v20 }
 0x303   : > { %1071 = vst [vmem:[%s1988_s7] sm:$0xff] %v1070_v22 }
 0x304   : > { %1690 = shalt.err (!%p1687_p12)
}
 0x305   : > { %1345 = dma.vmem_to_hbm [thread:$0]  (%p1918_p13), %s1108_s25, 128, %s1110_s22, %s1078_s23  }
 0x306 PF: > { %p1386_p8 = scmp.ge.s32.totalorder %s1745_s20, 2  ;;  %s1121_s3 = sand.u32 1, %s1733_s17  }
 0x307   : > { %s1122_s7 = scalar_lea.sflag [#allocation6], %s1121_s3 }
 0x308   : > { %p1369_p7 = pnand %p1386_p8, %p1923_p5 }
 0x30a   : > { %p1370_p9 = pneg %p1369_p7 }
 0x30c   : > { %1724 = dma.done.wait (%p1370_p9), %s1122_s7, 256  }
 0x30d   : > { %1726 = vsyncadd (%p1370_p9), %s1122_s7, 4294967040  ;;  %s1132_s13 = scalar_lea.sflag [#allocation17], %s1121_s3 }
 0x30e   : > { %1728 = dma.done.wait (%p1370_p9), %s1132_s13, 128  }
 0x30f   : > { %1730 = vsyncadd (%p1370_p9), %s1132_s13, 4294967168  ;;  %p31_p13 = scmp.ge.s32.totalorder %s1898_s14, 8   ;;  %s2107_s17 = smov %s1737_s18 }
 0x310   : > { %s2108_s18 = smov %s1741_s19  ;;  %s2109_s19 = smov %s1910_s16 }
 0x311   : > { %s2110_s20 = smov %s1898_s14  ;;  %33 = sbr.rel (!%p31_p13) target bundleno = 16 (0x10), region = 154 }
 0x316   :  { %1138 = vsyncpa [#allocation5], 1 }
 0x317   :  { %1140 = vsyncpa [#allocation5 + $0x1], 1 }
 0x318   :  { %1141 = vsyncpa [#allocation8], 1 }
 0x319   :  { %1142 = vsyncpa [#allocation11], 1 }
 0x31a   :  { %1143 = vsyncpa [#allocation14], 1 }
 0x31b   :  { %1144 = vsyncpa [#allocation6], 1 }
 0x31c   :  { %1146 = vsyncpa [#allocation6 + $0x1], 1 }
 0x31d   :  { %1147 = vsyncpa [#allocation17], 1 }
 0x31e   :  { %1149 = vsyncpa [#allocation17 + $0x1], 1 }

</bundles_post_ra>
